<compile_context>
chip_gen: v7x
topology: tpu7x:2x2x1
jax: 0.10.0
libtpu: 0.0.40
codegen_flags: <defaults>
</compile_context>

<pallas_src>
import functools

import jax
import jax.numpy as jnp
from jax.experimental import pallas as pl
from jax.experimental.pallas import tpu as pltpu

LANE = 128  # TPU lane width (last-dim alignment for weights / hidden dims)


def _round_up(x, m):
    return -(-x // m) * m


def _leaky_relu(x, slope=0.2):
    return jnp.where(x > 0, x, slope * x)


# ----------------------------------------------------------------------------
# Kernel body: fused 3-layer MLP on one batch tile.
# ----------------------------------------------------------------------------
def _mlp_kernel(x_ref, w1_ref, b1_ref, w2_ref, b2_ref, w3_ref, b3_ref, o_ref,
                *, last_activation):
    cdt = w1_ref.dtype  # matmul input dtype (bf16 by default)

    # x arrives straight from HBM in its original dtype (no wrapper pad/cast
    # pass); cast to the MXU dtype here — VPU work hidden under the DMA pipeline.
    x = x_ref[...].astype(cdt)

    h = jnp.dot(x, w1_ref[...], preferred_element_type=jnp.float32) + b1_ref[...]
    h = _leaky_relu(h)

    h = jnp.dot(h.astype(cdt), w2_ref[...],
                preferred_element_type=jnp.float32) + b2_ref[...]
    h = _leaky_relu(h)

    h = jnp.dot(h.astype(cdt), w3_ref[...],
                preferred_element_type=jnp.float32) + b3_ref[...]

    if last_activation == "sigmoid":
        # exp + approx reciprocal both run on the EUP slot -> VPU stays free.
        # Clamp so exp(-h) never overflows to +inf (sigmoid(-60) ~ 9e-27 ~ 0).
        h = pl.reciprocal(1.0 + jnp.exp(-jnp.maximum(h, -60.0)), approx=True)
    elif last_activation == "tanh":
        h = jnp.tanh(h)
    # else: identity head

    o_ref[...] = h.astype(o_ref.dtype)


# ----------------------------------------------------------------------------
# Generation / capability probes.
# ----------------------------------------------------------------------------
def _tpu_generation():
    """Best-effort (vmem_capacity_bytes, tensorcores_per_chip) for the local TPU."""
    vmem_cap = 64 * 1024 * 1024  # v7x-safe default
    num_tc = 1                   # conservative default: sequential grid
    kind = ""
    try:
        kind = jax.devices()[0].device_kind.lower()
    except Exception:
        pass
    if "v7" in kind:
        vmem_cap, num_tc = 64 << 20, 2           # 64 MiB / TC, 2 TC per chip
    elif "v6" in kind:
        vmem_cap, num_tc = 128 << 20, 1          # v6e
    elif "v5" in kind and ("lite" in kind or "v5e" in kind):
        vmem_cap, num_tc = 128 << 20, 1          # v5e
    elif "v5" in kind or "v4" in kind:
        vmem_cap, num_tc = 128 << 20, 2          # v4 / v5p megacore
    try:  # refine VMEM capacity from Pallas if the query is available
        cap = getattr(pltpu.get_tpu_info(), "vmem_capacity_bytes", None)
        if cap:
            vmem_cap = int(cap)
    except Exception:
        pass
    return vmem_cap, num_tc


def _buffered_blockspec_supported():
    """Narrow probe: does this jax support pipeline_mode=pl.Buffered(1)?"""
    if not hasattr(pl, "Buffered"):
        return False
    try:
        pl.BlockSpec((8, 128), lambda i: (0, 0), pipeline_mode=pl.Buffered(1))
    except TypeError:
        return False
    return True


# ----------------------------------------------------------------------------
# Pure-JAX reference (also the tiny-batch XLA fallback path).
# ----------------------------------------------------------------------------
def _reference(x, params, last_activation="sigmoid"):
    h = jnp.dot(x, params["w1"]) + params["b1"]
    h = jnp.where(h > 0, h, 0.2 * h)
    h = jnp.dot(h, params["w2"]) + params["b2"]
    h = jnp.where(h > 0, h, 0.2 * h)
    h = jnp.dot(h, params["w3"]) + params["b3"]
    if last_activation == "sigmoid":
        return jax.nn.sigmoid(h)
    if last_activation == "tanh":
        return jnp.tanh(h)
    return h


# ----------------------------------------------------------------------------
# Wrapper: BlockSpecs, grid, generation-aware tile selection.
# ----------------------------------------------------------------------------
def feed_forward_nn(x, params, *, last_activation="sigmoid", block_b=None,
                    compute_dtype=jnp.bfloat16, out_dtype=jnp.float32,
                    min_pallas_batch=0):
    """Fused 3-layer MLP forward.

    x:      [B, input_size]  (f32 or bf16; streamed to the kernel as-is)
    params: dict with w1 [in,h1], b1 [h1], w2 [h1,h2], b2 [h2], w3 [h2,h3], b3 [h3]
            (weights stored transposed vs. nn.Linear, i.e. [in_features, out_features])

    min_pallas_batch: below this batch size (grid==1, nothing to pipeline,
    launch/DMA-latency bound) the plain XLA path is used instead of Pallas.
    """
    w1, b1 = params["w1"], params["b1"]
    w2, b2 = params["w2"], params["b2"]
    w3, b3 = params["w3"], params["b3"]

    B, in_f = x.shape
    h1, h2, h3 = w1.shape[1], w2.shape[1], w3.shape[1]
    assert w1.shape[0] == in_f and w2.shape[0] == h1 and w3.shape[0] == h2

    if B < min_pallas_batch:
        return _reference(x, params, last_activation).astype(out_dtype)

    cdt = jnp.dtype(compute_dtype)
    odt = jnp.dtype(out_dtype)

    # ---- pad only the (tiny, one-off) weight/bias lane dims; x is untouched ----
    h1p, h2p, h3p = (_round_up(h, LANE) for h in (h1, h2, h3))

    def pad2(a, rows, cols):
        return jnp.pad(a, ((0, rows - a.shape[0]), (0, cols - a.shape[1])))

    # weights in the (narrow) compute dtype; biases stay f32 for the f32 accumulator
    w1p = pad2(w1, in_f, h1p).astype(cdt)
    w2p = pad2(w2, h1p, h2p).astype(cdt)
    w3p = pad2(w3, h2p, h3p).astype(cdt)
    b1p = pad2(b1.reshape(1, h1), 1, h1p).astype(jnp.float32)
    b2p = pad2(b2.reshape(1, h2), 1, h2p).astype(jnp.float32)
    b3p = pad2(b3.reshape(1, h3), 1, h3p).astype(jnp.float32)

    single_buf_weights = _buffered_blockspec_supported()
    vmem_cap, num_tc = _tpu_generation()

    # ---- generation-aware VMEM budgets ----
    if vmem_cap >= (96 << 20):            # 128 MiB parts (v5e / v6e / v5p / v4)
        vmem_limit = 80 << 20
        tile_budget = 48 << 20
        max_block_b = 2048
    else:                                  # v7x: 64 MiB physical per TensorCore
        vmem_limit = 32 << 20
        tile_budget = 20 << 20
        max_block_b = 1024

    x_isz = jnp.dtype(x.dtype).itemsize
    weight_bytes = (in_f * h1p + h1p * h2p + h2p * h3p) * cdt.itemsize
    bias_bytes = (h1p + h2p + h3p) * 4
    # accounting matches the buffering actually used (1x when Buffered(1))
    fixed_bytes = (1 if single_buf_weights else 2) * (weight_bytes + bias_bytes)
    # TODO(synk): block the hidden (N) dim of W1/W2 over a second grid axis when
    # resident weights no longer fit VMEM (not needed at GAN/MNIST sizes).
    assert fixed_bytes < tile_budget, (
        f"resident weights ({fixed_bytes} B) exceed the VMEM tile budget "
        f"({tile_budget} B); add an N-dim grid axis over the weights")

    in_f_lanes = _round_up(in_f, LANE)     # what Mosaic actually allocates per row
    per_row_bytes = (
        2 * in_f_lanes * x_isz             # x tile, double-buffered
        + in_f_lanes * cdt.itemsize        # in-kernel compute-dtype copy of x
        + 2 * h3p * odt.itemsize           # output tile, double-buffered
        + (h1p + h2p + h3p) * 4            # f32 intermediates
        + (h1p + h2p) * cdt.itemsize)      # compute-dtype copies fed to layers 2/3

    # sublane packing requirement for the x / out blocks
    sub = max(8, 32 // x_isz, 32 // odt.itemsize)
    b_pad_min = _round_up(B, sub)

    if block_b is None:
        avail = max(tile_budget - fixed_bytes, per_row_bytes * sub)
        cap = max(sub, min(max_block_b, int(avail // per_row_bytes)))
        ntiles = max(1, -(-b_pad_min // cap))
        # Split the batch across TensorCores only on multi-TC parts (v7x / v5p /
        # v4), where dimension_semantics=("parallel",) actually shards the grid.
        if num_tc >= 2 and ntiles < num_tc and b_pad_min >= num_tc * 128:
            ntiles = num_tc
        block_b = -(-b_pad_min // ntiles)
        if block_b >= 128:
            # MXU-friendly M: multiples of 128 (matters most on v5e's 128-wide MXU)
            block_b = _round_up(block_b, 128)
            block_b = min(block_b, max(128, (cap // 128) * 128))
        else:
            block_b = _round_up(block_b, sub)
    assert block_b > 0 and block_b % sub == 0, (
        f"block_b must be a positive multiple of {sub} (got {block_b})")

    # Pad the batch dim only (cheap; a no-op when B already divides block_b).
    B_pad = _round_up(B, block_b)
    x_in = x if B_pad == B else jnp.pad(x, ((0, B_pad - B), (0, 0)))
    grid = (B_pad // block_b,)

    def rep_spec(shape):
        # constant index_map -> data never changes: one buffer is enough
        if single_buf_weights:
            return pl.BlockSpec(shape, lambda i: (0, 0), pipeline_mode=pl.Buffered(1))
        return pl.BlockSpec(shape, lambda i: (0, 0))

    kernel = functools.partial(_mlp_kernel, last_activation=last_activation)

    out = pl.pallas_call(
        kernel,
        out_shape=jax.ShapeDtypeStruct((B_pad, h3p), odt),
        grid_spec=pltpu.PrefetchScalarGridSpec(
            num_scalar_prefetch=0,
            grid=grid,
            in_specs=[
                # x: last block dim equals the full feature dim (allowed), so no
                # wrapper-side lane padding / dtype cast of the activation stream.
                pl.BlockSpec((block_b, in_f), lambda i: (i, 0)),
                rep_spec((in_f, h1p)), rep_spec((1, h1p)),
                rep_spec((h1p, h2p)), rep_spec((1, h2p)),
                rep_spec((h2p, h3p)), rep_spec((1, h3p)),
            ],
            out_specs=pl.BlockSpec((block_b, h3p), lambda i: (i, 0)),
        ),
        compiler_params=pltpu.CompilerParams(
            dimension_semantics=("parallel",),
            vmem_limit_bytes=vmem_limit,
        ),
    )(x_in, w1p, b1p, w2p, b2p, w3p, b3p)

    return out[:B, :h3]


def init_params(key, input_size, hidden1, hidden2, hidden3):
    """Deterministic init matching nn.Linear shapes (stored transposed: [in, out])."""
    ks = jax.random.split(key, 6)

    def linear(kw, kb, fan_in, fan_out):
        bound = 1.0 / jnp.sqrt(fan_in)
        w = jax.random.uniform(kw, (fan_in, fan_out), jnp.float32, -bound, bound)
        b = jax.random.uniform(kb, (fan_out,), jnp.float32, -bound, bound)
        return w, b

    w1, b1 = linear(ks[0], ks[1], input_size, hidden1)
    w2, b2 = linear(ks[2], ks[3], hidden1, hidden2)
    w3, b3 = linear(ks[4], ks[5], hidden2, hidden3)
    return {"w1": w1, "b1": b1, "w2": w2, "b2": b2, "w3": w3, "b3": b3}


if __name__ == "__main__":
    # MNIST-style GAN shapes: flattened 28x28 image, train_bs=100,
    # discriminator head (sigmoid) and generator-style head (tanh).
    B = 100
    input_size = 784            # 28 * 28
    hidden1, hidden2, hidden3 = 256, 128, 1

    key = jax.random.PRNGKey(0)
    kx, kp = jax.random.split(key)
    x = jax.random.normal(kx, (B, input_size), jnp.float32)
    params = init_params(kp, input_size, hidden1, hidden2, hidden3)

    for act in ("sigmoid", "tanh"):
        out = feed_forward_nn(x, params, last_activation=act)
        out = jax.block_until_ready(out)
        ref = _reference(x, params, act)
        assert out.shape == (B, hidden3), out.shape
        # bf16 matmul inputs (f32 accumulation) -> ~1e-2-level tolerance vs f32 ref
        assert jnp.allclose(out, ref, atol=2e-2, rtol=2e-2), (
            f"mismatch vs reference for {act}: "
            f"max abs err {float(jnp.max(jnp.abs(out - ref)))}")

    print("KERNEL_OK")
</pallas_src>

<mosaic_0001>
module attributes {stable_mosaic.version = 11 : i64} {
  func.func @_mlp_kernel(%arg0: i32, %arg1: memref<104x784xf32, #tpu.memory_space<vmem>>, %arg2: memref<784x256xbf16, #tpu.memory_space<vmem>>, %arg3: memref<1x256xf32, #tpu.memory_space<vmem>>, %arg4: memref<256x128xbf16, #tpu.memory_space<vmem>>, %arg5: memref<1x128xf32, #tpu.memory_space<vmem>>, %arg6: memref<128x128xbf16, #tpu.memory_space<vmem>>, %arg7: memref<1x128xf32, #tpu.memory_space<vmem>>, %arg8: memref<104x128xf32, #tpu.memory_space<vmem>>) attributes {dimension_semantics = [#tpu.dimension_semantics<parallel>], iteration_bounds = array<i64: 1>, scalar_prefetch = 0 : i64, scratch_operands = 0 : i64, tpu.core_type = #tpu.core_type<tc>, window_params = [{transform_indices = @transform_0, window_bounds = array<i64: 104, 784>}, {pipeline_mode = #tpu.pipeline_mode<synchronous>, transform_indices = @transform_1, window_bounds = array<i64: 784, 256>}, {pipeline_mode = #tpu.pipeline_mode<synchronous>, transform_indices = @transform_2, window_bounds = array<i64: 1, 256>}, {pipeline_mode = #tpu.pipeline_mode<synchronous>, transform_indices = @transform_3, window_bounds = array<i64: 256, 128>}, {pipeline_mode = #tpu.pipeline_mode<synchronous>, transform_indices = @transform_4, window_bounds = array<i64: 1, 128>}, {pipeline_mode = #tpu.pipeline_mode<synchronous>, transform_indices = @transform_5, window_bounds = array<i64: 128, 128>}, {pipeline_mode = #tpu.pipeline_mode<synchronous>, transform_indices = @transform_6, window_bounds = array<i64: 1, 128>}, {transform_indices = @transform_7, window_bounds = array<i64: 104, 128>}]} {
    %c0 = arith.constant 0 : index
    %c0_0 = arith.constant 0 : index
    %0 = vector.load %arg1[%c0, %c0_0] : memref<104x784xf32, #tpu.memory_space<vmem>>, vector<104x784xf32>
    %1 = arith.truncf %0 : vector<104x784xf32> to vector<104x784xbf16>
    %c0_1 = arith.constant 0 : index
    %c0_2 = arith.constant 0 : index
    %2 = vector.load %arg2[%c0_1, %c0_2] : memref<784x256xbf16, #tpu.memory_space<vmem>>, vector<784x256xbf16>
    %cst = arith.constant dense<0.000000e+00> : vector<104x256xf32>
    %3 = tpu.matmul %1, %2, %cst {dimension_numbers = #tpu.dot_dimension_numbers<[1], [0], [0], [1], [0, 0, 1, 1], [], []>} : vector<104x784xbf16>, vector<784x256xbf16>, vector<104x256xf32> -> vector<104x256xf32>
    %c0_3 = arith.constant 0 : index
    %c0_4 = arith.constant 0 : index
    %4 = vector.load %arg3[%c0_3, %c0_4] : memref<1x256xf32, #tpu.memory_space<vmem>>, vector<1x256xf32>
    %5 = vector.broadcast %4 : vector<1x256xf32> to vector<104x256xf32>
    %6 = arith.addf %3, %5 : vector<104x256xf32>
    %cst_5 = arith.constant 0.000000e+00 : f32
    %7 = vector.broadcast %cst_5 : f32 to vector<104x256xf32>
    %8 = arith.cmpf ogt, %6, %7 : vector<104x256xf32>
    %cst_6 = arith.constant 2.000000e-01 : f32
    %9 = vector.broadcast %cst_6 : f32 to vector<104x256xf32>
    %10 = arith.mulf %9, %6 : vector<104x256xf32>
    %11 = arith.select %8, %6, %10 : vector<104x256xi1>, vector<104x256xf32>
    %12 = arith.truncf %11 : vector<104x256xf32> to vector<104x256xbf16>
    %c0_7 = arith.constant 0 : index
    %c0_8 = arith.constant 0 : index
    %13 = vector.load %arg4[%c0_7, %c0_8] : memref<256x128xbf16, #tpu.memory_space<vmem>>, vector<256x128xbf16>
    %cst_9 = arith.constant dense<0.000000e+00> : vector<104x128xf32>
    %14 = tpu.matmul %12, %13, %cst_9 {dimension_numbers = #tpu.dot_dimension_numbers<[1], [0], [0], [1], [0, 0, 1, 1], [], []>} : vector<104x256xbf16>, vector<256x128xbf16>, vector<104x128xf32> -> vector<104x128xf32>
    %c0_10 = arith.constant 0 : index
    %c0_11 = arith.constant 0 : index
    %15 = vector.load %arg5[%c0_10, %c0_11] : memref<1x128xf32, #tpu.memory_space<vmem>>, vector<1x128xf32>
    %16 = vector.broadcast %15 : vector<1x128xf32> to vector<104x128xf32>
    %17 = arith.addf %14, %16 : vector<104x128xf32>
    %cst_12 = arith.constant 0.000000e+00 : f32
    %18 = vector.broadcast %cst_12 : f32 to vector<104x128xf32>
    %19 = arith.cmpf ogt, %17, %18 : vector<104x128xf32>
    %cst_13 = arith.constant 2.000000e-01 : f32
    %20 = vector.broadcast %cst_13 : f32 to vector<104x128xf32>
    %21 = arith.mulf %20, %17 : vector<104x128xf32>
    %22 = arith.select %19, %17, %21 : vector<104x128xi1>, vector<104x128xf32>
    %23 = arith.truncf %22 : vector<104x128xf32> to vector<104x128xbf16>
    %c0_14 = arith.constant 0 : index
    %c0_15 = arith.constant 0 : index
    %24 = vector.load %arg6[%c0_14, %c0_15] : memref<128x128xbf16, #tpu.memory_space<vmem>>, vector<128x128xbf16>
    %cst_16 = arith.constant dense<0.000000e+00> : vector<104x128xf32>
    %25 = tpu.matmul %23, %24, %cst_16 {dimension_numbers = #tpu.dot_dimension_numbers<[1], [0], [0], [1], [0, 0, 1, 1], [], []>} : vector<104x128xbf16>, vector<128x128xbf16>, vector<104x128xf32> -> vector<104x128xf32>
    %c0_17 = arith.constant 0 : index
    %c0_18 = arith.constant 0 : index
    %26 = vector.load %arg7[%c0_17, %c0_18] : memref<1x128xf32, #tpu.memory_space<vmem>>, vector<1x128xf32>
    %27 = vector.broadcast %26 : vector<1x128xf32> to vector<104x128xf32>
    %28 = arith.addf %25, %27 : vector<104x128xf32>
    %cst_19 = arith.constant -6.000000e+01 : f32
    %29 = vector.broadcast %cst_19 : f32 to vector<104x128xf32>
    %30 = arith.maximumf %28, %29 : vector<104x128xf32>
    %cst_20 = arith.constant 0.000000e+00 : f32
    %31 = vector.broadcast %cst_20 : f32 to vector<104x128xf32>
    %32 = arith.subf %31, %30 : vector<104x128xf32>
    %33 = math.exp %32 : vector<104x128xf32>
    %cst_21 = arith.constant 1.000000e+00 : f32
    %34 = vector.broadcast %cst_21 : f32 to vector<104x128xf32>
    %35 = arith.addf %34, %33 : vector<104x128xf32>
    %36 = tpu.reciprocal %35 {approx = true} : vector<104x128xf32> -> vector<104x128xf32>
    %c0_22 = arith.constant 0 : index
    %c0_23 = arith.constant 0 : index
    %37 = vector.load %arg8[%c0_22, %c0_23] : memref<104x128xf32, #tpu.memory_space<vmem>>, vector<104x128xf32>
    tpu.vector_store %arg8[%c0_22, %c0_23], %36 {strides = array<i32>} : memref<104x128xf32, #tpu.memory_space<vmem>>, vector<104x128xf32>,
    return
  }
  func.func @transform_0(%arg0: i32) -> (i32, i32) {
    %c0_i32 = arith.constant 0 : i32
    %c0_i32_0 = arith.constant 0 : i32
    return %arg0, %c0_i32 : i32, i32
  }
  func.func @transform_1(%arg0: i32) -> (i32, i32) {
    %c0_i32 = arith.constant 0 : i32
    %c0_i32_0 = arith.constant 0 : i32
    %c0_i32_1 = arith.constant 0 : i32
    return %c0_i32, %c0_i32_0 : i32, i32
  }
  func.func @transform_2(%arg0: i32) -> (i32, i32) {
    %c0_i32 = arith.constant 0 : i32
    %c0_i32_0 = arith.constant 0 : i32
    %c0_i32_1 = arith.constant 0 : i32
    return %c0_i32, %c0_i32_0 : i32, i32
  }
  func.func @transform_3(%arg0: i32) -> (i32, i32) {
    %c0_i32 = arith.constant 0 : i32
    %c0_i32_0 = arith.constant 0 : i32
    %c0_i32_1 = arith.constant 0 : i32
    return %c0_i32, %c0_i32_0 : i32, i32
  }
  func.func @transform_4(%arg0: i32) -> (i32, i32) {
    %c0_i32 = arith.constant 0 : i32
    %c0_i32_0 = arith.constant 0 : i32
    %c0_i32_1 = arith.constant 0 : i32
    return %c0_i32, %c0_i32_0 : i32, i32
  }
  func.func @transform_5(%arg0: i32) -> (i32, i32) {
    %c0_i32 = arith.constant 0 : i32
    %c0_i32_0 = arith.constant 0 : i32
    %c0_i32_1 = arith.constant 0 : i32
    return %c0_i32, %c0_i32_0 : i32, i32
  }
  func.func @transform_6(%arg0: i32) -> (i32, i32) {
    %c0_i32 = arith.constant 0 : i32
    %c0_i32_0 = arith.constant 0 : i32
    %c0_i32_1 = arith.constant 0 : i32
    return %c0_i32, %c0_i32_0 : i32, i32
  }
  func.func @transform_7(%arg0: i32) -> (i32, i32) {
    %c0_i32 = arith.constant 0 : i32
    %c0_i32_0 = arith.constant 0 : i32
    return %arg0, %c0_i32 : i32, i32
  }
}

</mosaic_0001>

<bundles_post_ra>
// kernel: tpu_custom_call.1
= control target key start
LH: loop header
LB: loop body
LE: loop exit
PB: predicated region body
PF: predicated region fallthrough
CT: control target
= control target key end

     0   :  { %12 = vsyncpa [#allocation3], 0  ;;  %s2862_s0 = inlined_call_operand.hbm [shape: f32[104,784], index: 0, kind: input, shape index: {}]   ;;  %s2863_s1 = inlined_call_operand.hbm [shape: bf16[784,256], index: 1, kind: input, shape index: {}]   ;;  %s2864_s2 = inlined_call_operand.vmem [shape: f32[1,256], index: 2, kind: input, shape index: {}]   ;;  %s2865_s3 = inlined_call_operand.hbm [shape: bf16[256,128], index: 3, kind: input, shape index: {}]   ;;  %s2866_s4 = inlined_call_operand.vmem [shape: f32[1,128], index: 4, kind: input, shape index: {}]   ;;  %s2867_s5 = inlined_call_operand.hbm [shape: bf16[128,128], index: 5, kind: input, shape index: {}]   ;;  %s2868_s6 = inlined_call_operand.vmem [shape: f32[1,128], index: 6, kind: input, shape index: {}]   ;;  %s2869_s7 = inlined_call_operand.hbm [shape: f32[104,128], index: 7, kind: output, shape index: {}]  }
   0x1   :  { %13 = vsyncpa [#allocation6], 0 }
   0x2   :  { %14 = vsyncpa [#allocation9], 0 }
   0x3   :  { %15 = vsyncpa [#allocation4], 0  ;;  %s2590_s24 = smov [#allocation5]   ;;  %s2472_s28 = scalar_lea.hbm %s2863_s1, 12544 }
   0x4   :  { %s33_s25 = sshll.u32 %s2590_s24, 4  ;;  %p2473_p0 = scmp.ne.s32.totalorder %s2863_s1, %s2472_s28  ;;  %s34_s25 = int_to_ptr.vmem [resolvable:$true] %s33_s25 }
   0x5   :  { %p2476_p1 = scmp.lt.u32.totalorder %s2472_s28, %s2863_s1 }
   0x7   :  { %p2478_p2 = pnand %p2476_p1, %p2473_p0 }
   0x9   :  { %2481 = shalt.err (!%p2478_p2)
}
   0xa   :  { %s2482_s10 = scalar_lea.vmem %s34_s25, 12544  ;;  %p2487_p4 = scmp.lt.s32.totalorder %s34_s25, %s34_s25 }
   0xb   :  { %p2483_p3 = scmp.ne.s32.totalorder %s34_s25, %s2482_s10  ;;  %p2488_p5 = scmp.lt.s32.totalorder %s2482_s10, %s2482_s10 }
   0xd   :  { %p2489_p6 = por %p2488_p5, %p2487_p4 }
   0xf   :  { %p2490_p7 = pnand %p2489_p6, %p2483_p3 }
  0x11   :  { %2493 = shalt.err (!%p2490_p7)
}
  0x12   :  { %s2591_s11 = smov 128   ;;  %s2592_s12 = smov 8  }
  0x13   :  { %39 = dma.hbm_to_vmem [thread:$0]  %s2863_s1, 12544, %s34_s25, [#allocation6], %s2591_s11, %s2591_s11, %s2592_s12  }
  0x14   :  { %s2593_s15 = smov [#allocation2]   ;;  %s2494_s19 = scalar_lea.hbm %s2862_s0, 11648 }
  0x15   :  { %s21_s16 = sshll.u32 %s2593_s15, 4  ;;  %p2495_p8 = scmp.ne.s32.totalorder %s2862_s0, %s2494_s19  ;;  %s22_s16 = int_to_ptr.vmem [resolvable:$true] %s21_s16 }
  0x16   :  { %p2498_p9 = scmp.lt.u32.totalorder %s2494_s19, %s2862_s0 }
  0x18   :  { %p2500_p10 = pnand %p2498_p9, %p2495_p8 }
  0x1a   :  { %2503 = shalt.err (!%p2500_p10)
}
  0x1b   :  { %s2504_s24 = scalar_lea.vmem %s22_s16, 11648  ;;  %p2509_p12 = scmp.lt.s32.totalorder %s22_s16, %s22_s16 }
  0x1c   :  { %p2505_p11 = scmp.ne.s32.totalorder %s22_s16, %s2504_s24  ;;  %p2510_p13 = scmp.lt.s32.totalorder %s2504_s24, %s2504_s24 }
  0x1e   :  { %p2511_p0 = por %p2510_p13, %p2509_p12 }
  0x20   :  { %p2512_p1 = pnand %p2511_p0, %p2505_p11 }
  0x22   :  { %2515 = shalt.err (!%p2512_p1)
}
  0x23   :  { %s2594_s1 = smov 896   ;;  %s2595_s25 = smov 56  }
  0x24   :  { %27 = dma.hbm_to_vmem [thread:$0]  %s2862_s0, 11648, %s22_s16, [#allocation3], %s2594_s1, %s2594_s1, %s2595_s25  }
  0x25   :  { %s2596_s28 = smov [#allocation7]   ;;  %s2516_s9 = scalar_lea.hbm %s2865_s3, 2048 }
  0x26   :  { %s47_s29 = sshll.u32 %s2596_s28, 4  ;;  %p2517_p2 = scmp.ne.s32.totalorder %s2865_s3, %s2516_s9  ;;  %s48_s29 = int_to_ptr.vmem [resolvable:$true] %s47_s29 }
  0x27   :  { %p2520_p3 = scmp.lt.u32.totalorder %s2516_s9, %s2865_s3 }
  0x29   :  { %p2522_p4 = pnand %p2520_p3, %p2517_p2 }
  0x2b   :  { %2525 = shalt.err (!%p2522_p4)
}
  0x2c   :  { %s2526_s17 = scalar_lea.vmem %s48_s29, 2048  ;;  %p2531_p6 = scmp.lt.s32.totalorder %s48_s29, %s48_s29 }
  0x2d   :  { %p2527_p5 = scmp.ne.s32.totalorder %s48_s29, %s2526_s17  ;;  %p2532_p7 = scmp.lt.s32.totalorder %s2526_s17, %s2526_s17 }
  0x2f   :  { %p2533_p8 = por %p2532_p7, %p2531_p6 }
  0x31   :  { %p2534_p9 = pnand %p2533_p8, %p2527_p5 }
  0x33   :  { %2537 = shalt.err (!%p2534_p9)
}
  0x34   :  { %s2597_s0 = smov 64   ;;  %s2598_s16 = smov 4  }
  0x35   :  { %53 = dma.hbm_to_vmem [thread:$0]  %s2865_s3, 2048, %s48_s29, [#allocation6], %s2597_s0, %s2597_s0, %s2598_s16  }
  0x36   :  { %s2599_s20 = smov [#allocation8]   ;;  %s2538_s24 = scalar_lea.hbm %s2867_s5, 1024 }
  0x37   :  { %s61_s21 = sshll.u32 %s2599_s20, 4  ;;  %p2539_p10 = scmp.ne.s32.totalorder %s2867_s5, %s2538_s24  ;;  %s62_s21 = int_to_ptr.vmem [resolvable:$true] %s61_s21 }
  0x38   :  { %p2542_p11 = scmp.lt.u32.totalorder %s2538_s24, %s2867_s5 }
  0x3a   :  { %p2544_p12 = pnand %p2542_p11, %p2539_p10 }
  0x3c   :  { %2547 = shalt.err (!%p2544_p12)
}
  0x3d   :  { %s2548_s28 = scalar_lea.vmem %s62_s21, 1024  ;;  %p2553_p0 = scmp.lt.s32.totalorder %s62_s21, %s62_s21 }
  0x3e   :  { %p2549_p13 = scmp.ne.s32.totalorder %s62_s21, %s2548_s28  ;;  %p2554_p1 = scmp.lt.s32.totalorder %s2548_s28, %s2548_s28 }
  0x40   :  { %p2555_p2 = por %p2554_p1, %p2553_p0 }
  0x42   :  { %p2556_p3 = pnand %p2555_p2, %p2549_p13 }
  0x44   :  { %2559 = shalt.err (!%p2556_p3)
}
  0x45   :  { %67 = dma.hbm_to_vmem [thread:$0]  %s2867_s5, 1024, %s62_s21, [#allocation9], %s2597_s0, %s2597_s0, %s2598_s16  }
  0x46   :  { %2582 = dma.done.wait [#allocation3], 11648  }
  0x47   :  { %2583 = vsyncadd [#allocation3], 4294955648 }
  0x48   :  { %2584 = dma.done.wait [#allocation6], 14592  }
  0x49   :  { %2585 = vsyncadd [#allocation6], 4294952704 }
  0x4a   :  { %2586 = dma.done.wait [#allocation9], 1024  }
  0x4b   :  { %2587 = vsyncadd [#allocation9], 4294966272  ;;  %v2249_v0 = vld [vmem:[#allocation5 + $0x104] ss:$8 sps:$4 sm:$0xff]   ;;  %v2251_v1 = vld [vmem:[#allocation5 + $0x100] ss:$8 sps:$4 sm:$0xff]  }
  0x4c   :  { %946 = vmatprep.subr.bf16.mxu0 %v2249_v0  ;;  %v2252_v2 = vld [vmem:[#allocation5 + $0x114] ss:$8 sps:$4 sm:$0xff]   ;;  %v2254_v3 = vld [vmem:[#allocation5 + $0x110] ss:$8 sps:$4 sm:$0xff]   ;;  %v2255_v4 = vld [vmem:[#allocation5 + $0x124] ss:$8 sps:$4 sm:$0xff]  }
  0x4d   :  { %947 = vmatpush1.bf16.msra.mxu0 %v2251_v1  ;;  %v2257_v5 = vld [vmem:[#allocation5 + $0x120] ss:$8 sps:$4 sm:$0xff]   ;;  %v2258_v6 = vld [vmem:[#allocation5 + $0x134] ss:$8 sps:$4 sm:$0xff]   ;;  %v2260_v7 = vld [vmem:[#allocation5 + $0x130] ss:$8 sps:$4 sm:$0xff]  }
  0x4e   :  { %948 = vmatprep.subr.bf16.mxu0 %v2252_v2  ;;  %v2261_v8 = vld [vmem:[#allocation5 + $0x144] ss:$8 sps:$4 sm:$0xff]   ;;  %v2263_v9 = vld [vmem:[#allocation5 + $0x140] ss:$8 sps:$4 sm:$0xff]   ;;  %v2264_v10 = vld [vmem:[#allocation5 + $0x154] ss:$8 sps:$4 sm:$0xff]  }
  0x4f   :  { %v2266_v11 = vld [vmem:[#allocation5 + $0x150] ss:$8 sps:$4 sm:$0xff]   ;;  %v2267_v12 = vld [vmem:[#allocation5 + $0x164] ss:$8 sps:$4 sm:$0xff]   ;;  %v2269_v16 = vld [vmem:[#allocation5 + $0x160] ss:$8 sps:$4 sm:$0xff]  }
  0x50   :  { %v86_v13 = vld [vmem:[#allocation2 + $0x18] sm:$0xff]  ;;  %v93_v14 = vld [vmem:[#allocation2 + $0x50] sm:$0xff]  ;;  %v92_v44 = vld [vmem:[#allocation2 + $0x48] sm:$0xff]  ;;  %vm823_vm0 = vcmask 130048  }
  0x51   :  { %949 = vmatpush1.bf16.msra.mxu0 %v2254_v3  ;;  %v177_v15 = vpack.c.bf16 %v93_v14, %v86_v13  ;;  %v2270_v17 = vld [vmem:[#allocation5 + $0x174] ss:$8 sps:$4 sm:$0xff]   ;;  %v2272_v18 = vld [vmem:[#allocation5 + $0x170] ss:$8 sps:$4 sm:$0xff]   ;;  %v2273_v19 = vld [vmem:[#allocation5 + $0x184] ss:$8 sps:$4 sm:$0xff]  }
  0x52   :  { %950 = vmatprep.subr.bf16.mxu0 %v2255_v4  ;;  %v2275_v20 = vld [vmem:[#allocation5 + $0x180] ss:$8 sps:$4 sm:$0xff]   ;;  %v2276_v21 = vld [vmem:[#allocation5 + $0x194] ss:$8 sps:$4 sm:$0xff]   ;;  %v2278_v22 = vld [vmem:[#allocation5 + $0x190] ss:$8 sps:$4 sm:$0xff]  }
  0x53   :  { %978 = vmatprep.mubr.bf16.mxu0 %v177_v15  ;;  %v2279_v23 = vld [vmem:[#allocation5 + $0x1a4] ss:$8 sps:$4 sm:$0xff]   ;;  %v2281_v24 = vld [vmem:[#allocation5 + $0x1a0] ss:$8 sps:$4 sm:$0xff]   ;;  %v2282_v25 = vld [vmem:[#allocation5 + $0x1b4] ss:$8 sps:$4 sm:$0xff]  }
  0x54   :  { %v2284_v26 = vld [vmem:[#allocation5 + $0x1b0] ss:$8 sps:$4 sm:$0xff]   ;;  %v2285_v27 = vld [vmem:[#allocation5 + $0x1c4] ss:$8 sps:$4 sm:$0xff]   ;;  %v2287_v28 = vld [vmem:[#allocation5 + $0x1c0] ss:$8 sps:$4 sm:$0xff]  }
  0x55   :  { %951 = vmatpush1.bf16.msra.mxu0 %v2257_v5  ;;  %v2336_v29 = vld [vmem:[#allocation5 + $0x4] ss:$8 sps:$4 sm:$0xff]   ;;  %v2288_v30 = vld [vmem:[#allocation5 + $0x1d4] ss:$8 sps:$4 sm:$0xff]   ;;  %v2341_v31 = vld [vmem:[#allocation5] ss:$8 sps:$4 sm:$0xff]  }
  0x56   :  { %952 = vmatprep.subr.bf16.mxu0 %v2258_v6  ;;  %845 = vmatprep.subr.bf16.mxu1 %v2336_v29  ;;  %v2342_v32 = vld [vmem:[#allocation5 + $0x14] ss:$8 sps:$4 sm:$0xff]   ;;  %v2290_v33 = vld [vmem:[#allocation5 + $0x1d0] ss:$8 sps:$4 sm:$0xff]   ;;  %v2291_v34 = vld [vmem:[#allocation5 + $0x1e4] ss:$8 sps:$4 sm:$0xff]  }
  0x57   :  { %846 = vmatpush1.bf16.msra.mxu1 %v2341_v31  ;;  %v2347_v35 = vld [vmem:[#allocation5 + $0x10] ss:$8 sps:$4 sm:$0xff]   ;;  %v2348_v36 = vld [vmem:[#allocation5 + $0x24] ss:$8 sps:$4 sm:$0xff]   ;;  %v2293_v37 = vld [vmem:[#allocation5 + $0x1e0] ss:$8 sps:$4 sm:$0xff]  }
  0x58   :  { %847 = vmatprep.subr.bf16.mxu1 %v2342_v32  ;;  %v2294_v38 = vld [vmem:[#allocation5 + $0x1f4] ss:$8 sps:$4 sm:$0xff]   ;;  %v2353_v39 = vld [vmem:[#allocation5 + $0x20] ss:$8 sps:$4 sm:$0xff]   ;;  %v2296_v41 = vld [vmem:[#allocation5 + $0x1f0] ss:$8 sps:$4 sm:$0xff]  }
  0x59   :  { %953 = vmatpush1.bf16.msra.mxu0 %v2260_v7  ;;  %v2354_v40 = vld [vmem:[#allocation5 + $0x34] ss:$8 sps:$4 sm:$0xff]   ;;  %v2299_v42 = vld [vmem:[#allocation5 + $0x204] ss:$8 sps:$4 sm:$0xff]   ;;  %v2359_v45 = vld [vmem:[#allocation5 + $0x30] ss:$8 sps:$4 sm:$0xff]  }
  0x5a   :  { %954 = vmatprep.subr.bf16.mxu0 %v2261_v8  ;;  %v85_v43 = vld [vmem:[#allocation2 + $0x10] sm:$0xff]  ;;  %v100_v46 = vld [vmem:[#allocation2 + $0x88] sm:$0xff]  ;;  %v107_v47 = vld [vmem:[#allocation2 + $0xc0] sm:$0xff] }
  0x5b   :  { %848 = vmatpush1.bf16.msra.mxu1 %v2347_v35  ;;  %v2360_v48 = vld [vmem:[#allocation5 + $0x44] ss:$8 sps:$4 sm:$0xff]   ;;  %v176_v49 = vpack.c.bf16 %v92_v44, %v85_v43  ;;  %v2297_v50 = vld [vmem:[#allocation5 + $0x200] ss:$8 sps:$4 sm:$0xff]   ;;  %v184_v51 = vpack.c.bf16 %v107_v47, %v100_v46  ;;  %v2302_v52 = vld [vmem:[#allocation5 + $0x214] ss:$8 sps:$4 sm:$0xff]  }
  0x5c   :  { %849 = vmatprep.subr.bf16.mxu1 %v2348_v36  ;;  %v2362_v53 = vld [vmem:[#allocation5 + $0x40] ss:$8 sps:$4 sm:$0xff]   ;;  %v2363_v54 = vld [vmem:[#allocation5 + $0x54] ss:$8 sps:$4 sm:$0xff]   ;;  %v2300_v55 = vld [vmem:[#allocation5 + $0x210] ss:$8 sps:$4 sm:$0xff]  }
  0x5d   :  { %955 = vmatpush1.bf16.msra.mxu0 %v2263_v9  ;;  %v2305_v56 = vld [vmem:[#allocation5 + $0x224] ss:$8 sps:$4 sm:$0xff]   ;;  %v121_v60 = vld [vmem:[#allocation2 + $0x130] sm:$0xff]  ;;  %v2303_v0 = vld [vmem:[#allocation5 + $0x220] ss:$8 sps:$4 sm:$0xff]  }
  0x5e   :  { %956 = vmatprep.subr.bf16.mxu0 %v2264_v10  ;;  %v99_v57 = vld [vmem:[#allocation2 + $0x80] sm:$0xff]  ;;  %v106_v58 = vld [vmem:[#allocation2 + $0xb8] sm:$0xff]  ;;  %v2365_v61 = vld [vmem:[#allocation5 + $0x50] ss:$8 sps:$4 sm:$0xff]  }
  0x5f   :  { %850 = vmatpush1.bf16.msra.mxu1 %v2353_v39  ;;  %v114_v59 = vld [vmem:[#allocation2 + $0xf8] sm:$0xff]  ;;  %v183_v63 = vpack.c.bf16 %v106_v58, %v99_v57  ;;  %v2308_v2 = vld [vmem:[#allocation5 + $0x234] ss:$8 sps:$4 sm:$0xff]   ;;  %v2306_v5 = vld [vmem:[#allocation5 + $0x230] ss:$8 sps:$4 sm:$0xff]  }
  0x60   :  { %851 = vmatprep.subr.bf16.mxu1 %v2354_v40  ;;  %v2366_v62 = vld [vmem:[#allocation5 + $0x64] ss:$8 sps:$4 sm:$0xff]   ;;  %v191_v1 = vpack.c.bf16 %v121_v60, %v114_v59  ;;  %v2368_v3 = vld [vmem:[#allocation5 + $0x60] ss:$8 sps:$4 sm:$0xff]   ;;  %v2369_v4 = vld [vmem:[#allocation5 + $0x74] ss:$8 sps:$4 sm:$0xff]  }
  0x61   :  { %957 = vmatpush1.bf16.msra.mxu0 %v2266_v11  ;;  %v2311_v6 = vld [vmem:[#allocation5 + $0x244] ss:$8 sps:$4 sm:$0xff]   ;;  %v113_v7 = vld [vmem:[#allocation2 + $0xf0] sm:$0xff]  ;;  %v120_v8 = vld [vmem:[#allocation2 + $0x128] sm:$0xff] }
  0x62   :  { %958 = vmatprep.subr.bf16.mxu0 %v2267_v12  ;;  %v128_v9 = vld [vmem:[#allocation2 + $0x168] sm:$0xff]  ;;  %v135_v10 = vld [vmem:[#allocation2 + $0x1a0] sm:$0xff]  ;;  %v190_v13 = vpack.c.bf16 %v120_v8, %v113_v7  ;;  %v90_v7 = vld [vmem:[#allocation2 + $0x38] sm:$0xff] }
  0x63   :  { %852 = vmatpush1.bf16.msra.mxu1 %v2359_v45  ;;  %v2371_v11 = vld [vmem:[#allocation5 + $0x70] ss:$8 sps:$4 sm:$0xff]   ;;  %v2372_v12 = vld [vmem:[#allocation5 + $0x84] ss:$8 sps:$4 sm:$0xff]   ;;  %v2309_v14 = vld [vmem:[#allocation5 + $0x240] ss:$8 sps:$4 sm:$0xff]   ;;  %v198_v15 = vpack.c.bf16 %v135_v10, %v128_v9 }
  0x64   :  { %853 = vmatprep.subr.bf16.mxu1 %v2360_v48  ;;  %v2378_v29 = vld [vmem:[#allocation5 + $0xa4] ss:$8 sps:$4 sm:$0xff]   ;;  %v2315_v31 = vld [vmem:[#allocation5 + $0x260] ss:$8 sps:$4 sm:$0xff]   ;;  %v2381_v35 = vld [vmem:[#allocation5 + $0xb4] ss:$8 sps:$4 sm:$0xff]  }
  0x65   :  { %959 = vmatpush1.bf16.msra.mxu0 %v2269_v16  ;;  %v2314_v16 = vld [vmem:[#allocation5 + $0x254] ss:$8 sps:$4 sm:$0xff]   ;;  %v2318_v36 = vld [vmem:[#allocation5 + $0x270] ss:$8 sps:$4 sm:$0xff]   ;;  %v2321_v43 = vld [vmem:[#allocation5 + $0x280] ss:$8 sps:$4 sm:$0xff]  }
  0x66   :  { %960 = vmatprep.subr.bf16.mxu0 %v2270_v17  ;;  %v2374_v17 = vld [vmem:[#allocation5 + $0x80] ss:$8 sps:$4 sm:$0xff]   ;;  %v148_v39 = vld [vmem:[#allocation2 + $0x208] sm:$0xff]  ;;  %v2384_v44 = vld [vmem:[#allocation5 + $0xc4] ss:$8 sps:$4 sm:$0xff]  }
  0x67   :  { %854 = vmatpush1.bf16.msra.mxu1 %v2362_v53  ;;  %v156_v40 = vld [vmem:[#allocation2 + $0x248] sm:$0xff]  ;;  %v2386_v47 = vld [vmem:[#allocation5 + $0xc0] ss:$8 sps:$4 sm:$0xff]   ;;  %v2329_v53 = vld [vmem:[#allocation5 + $0x2a4] ss:$8 sps:$4 sm:$0xff]  }
  0x68   :  { %855 = vmatprep.subr.bf16.mxu1 %v2363_v54  ;;  %v2326_v45 = vld [vmem:[#allocation5 + $0x294] ss:$8 sps:$4 sm:$0xff]   ;;  %v170_v54 = vld [vmem:[#allocation2 + $0x2b8] sm:$0xff] }
  0x69   :  { %961 = vmatpush1.bf16.msra.mxu0 %v2272_v18  ;;  %v2375_v18 = vld [vmem:[#allocation5 + $0x94] ss:$8 sps:$4 sm:$0xff]   ;;  %v2327_v57 = vld [vmem:[#allocation5 + $0x2a0] ss:$8 sps:$4 sm:$0xff]  }
  0x6a   :  { %962 = vmatprep.subr.bf16.mxu0 %v2273_v19  ;;  %v2312_v19 = vld [vmem:[#allocation5 + $0x250] ss:$8 sps:$4 sm:$0xff]   ;;  %v2332_v58 = vld [vmem:[#allocation5 + $0x2b4] ss:$8 sps:$4 sm:$0xff]   ;;  %v2392_v60 = vld [vmem:[#allocation5 + $0xe0] ss:$8 sps:$4 sm:$0xff]  }
  0x6b   :  { %856 = vmatpush1.bf16.msra.mxu1 %v2365_v61  ;;  %v219_v61 = vpack.c.bf16 %v170_v54, %v170_v54  ;;  %v2396_v8 = vld [vmem:[#allocation7 + $0x40] sm:$0xff]   ;;  %v123_v54 = vld [vmem:[#allocation2 + $0x140] sm:$0xff] }
  0x6c   :  { %857 = vmatprep.subr.bf16.mxu1 %v2366_v62  ;;  %v2393_v62 = vld [vmem:[#allocation5 + $0xf4] ss:$8 sps:$4 sm:$0xff]  }
  0x6d   :  { %963 = vmatpush1.bf16.msra.mxu0 %v2275_v20  ;;  %v2317_v20 = vld [vmem:[#allocation5 + $0x264] ss:$8 sps:$4 sm:$0xff]   ;;  %v2340_v9 = vld [vmem:[#allocation5 + $0x2d4] ss:$8 sps:$4 sm:$0xff]  }
  0x6e   :  { %964 = vmatprep.subr.bf16.mxu0 %v2276_v21  ;;  %v84_v21 = vld [vmem:[#allocation2 + $0x8] sm:$0xff] }
  0x6f   :  { %858 = vmatpush1.bf16.msra.mxu1 %v2368_v3  ;;  %v95_v3 = vld [vmem:[#allocation2 + $0x60] sm:$0xff] }
  0x70   :  { %859 = vmatprep.subr.bf16.mxu1 %v2369_v4  ;;  %v2395_v4 = vld [vmem:[#allocation5 + $0xf0] ss:$8 sps:$4 sm:$0xff]  }
  0x71   :  { %965 = vmatpush1.bf16.msra.mxu0 %v2278_v22  ;;  %v127_v22 = vld [vmem:[#allocation2 + $0x160] sm:$0xff] }
  0x72   :  { %966 = vmatprep.subr.bf16.mxu0 %v2279_v23  ;;  %v134_v23 = vld [vmem:[#allocation2 + $0x198] sm:$0xff] }
  0x73   :  { %860 = vmatpush1.bf16.msra.mxu1 %v2371_v11  ;;  %v98_v11 = vld [vmem:[#allocation2 + $0x78] sm:$0xff] }
  0x74   :  { %861 = vmatprep.subr.bf16.mxu1 %v2372_v12  ;;  %v105_v12 = vld [vmem:[#allocation2 + $0xb0] sm:$0xff] }
  0x75   :  { %967 = vmatpush1.bf16.msra.mxu0 %v2281_v24  ;;  %v91_v24 = vld [vmem:[#allocation2 + $0x40] sm:$0xff] }
  0x76   :  { %968 = vmatprep.subr.bf16.mxu0 %v2282_v25  ;;  %v142_v25 = vld [vmem:[#allocation2 + $0x1d8] sm:$0xff] }
  0x77   :  { %862 = vmatpush1.bf16.msra.mxu1 %v2374_v17  ;;  %v2338_v17 = vld [vmem:[#allocation5 + $0x2d0] ss:$8 sps:$4 sm:$0xff]  }
  0x78   :  { %863 = vmatprep.subr.bf16.mxu1 %v2375_v18  ;;  %v182_v18 = vpack.c.bf16 %v105_v12, %v98_v11  ;;  %v129_v12 = vld [vmem:[#allocation2 + $0x170] sm:$0xff] }
  0x79   :  { %969 = vmatpush1.bf16.msra.mxu0 %v2284_v26  ;;  %v149_v26 = vld [vmem:[#allocation2 + $0x210] sm:$0xff] }
  0x7a   :  { %970 = vmatprep.subr.bf16.mxu0 %v2285_v27  ;;  %v2377_v27 = vld [vmem:[#allocation5 + $0x90] ss:$8 sps:$4 sm:$0xff]   ;;  %v205_v32 = vpack.c.bf16 %v149_v26, %v142_v25  ;;  %v2400_v25 = vld [vmem:[#allocation7 + $0x50] sm:$0xff]  }
  0x7b   :  { %864 = vmatpush1.bf16.msra.mxu1 %v2377_v27  ;;  %v2344_v26 = vld [vmem:[#allocation5 + $0x2e0] ss:$8 sps:$4 sm:$0xff]   ;;  %v2352_v27 = vld [vmem:[#allocation5 + $0x2f4] ss:$8 sps:$4 sm:$0xff]  }
  0x7c   :  { %865 = vmatprep.subr.bf16.mxu1 %v2378_v29 }
  0x7d   :  { %971 = vmatpush1.bf16.msra.mxu0 %v2287_v28  ;;  %v175_v28 = vpack.c.bf16 %v91_v24, %v84_v21  ;;  %v104_v21 = vld [vmem:[#allocation2 + $0xa8] sm:$0xff]  ;;  %v119_v24 = vld [vmem:[#allocation2 + $0x120] sm:$0xff] }
  0x7e   :  { %972 = vmatprep.subr.bf16.mxu0 %v2288_v30  ;;  %v197_v30 = vpack.c.bf16 %v134_v23, %v127_v22  ;;  %v2399_v22 = vld [vmem:[#allocation7 + $0x8] sm:$0xff]   ;;  %v112_v23 = vld [vmem:[#allocation2 + $0xe8] sm:$0xff] }
  0x7f   :  { %877 = vmatprep.mubr.bf16.mxu1 %v175_v28  ;;  %v189_v29 = vpack.c.bf16 %v119_v24, %v112_v23  ;;  %v143_v23 = vld [vmem:[#allocation2 + $0x1e0] sm:$0xff]  ;;  %v150_v24 = vld [vmem:[#allocation2 + $0x218] sm:$0xff] }
  0x81   :  { %973 = vmatpush1.bf16.msra.mxu0 %v2290_v33  ;;  %v2320_v33 = vld [vmem:[#allocation5 + $0x274] ss:$8 sps:$4 sm:$0xff]  }
  0x82   :  { %974 = vmatprep.subr.bf16.mxu0 %v2291_v34  ;;  %v2380_v34 = vld [vmem:[#allocation5 + $0xa0] ss:$8 sps:$4 sm:$0xff]  }
  0x83   :  { %866 = vmatpush1.bf16.msra.mxu1 %v2380_v34  ;;  %v94_v34 = vld [vmem:[#allocation2 + $0x58] sm:$0xff] }
  0x84   :  { %867 = vmatprep.subr.bf16.mxu1 %v2381_v35  ;;  %v2358_v35 = vld [vmem:[#allocation5 + $0x304] ss:$8 sps:$4 sm:$0xff]  }
  0x85   :  { %975 = vmatpush1.bf16.msra.mxu0 %v2293_v37  ;;  %v2323_v37 = vld [vmem:[#allocation5 + $0x284] ss:$8 sps:$4 sm:$0xff]  }
  0x86   :  { %976 = vmatprep.subr.bf16.mxu0 %v2294_v38  ;;  %v141_v38 = vld [vmem:[#allocation2 + $0x1d0] sm:$0xff] }
  0x87   :  { %v204_v46 = vpack.c.bf16 %v148_v39, %v141_v38  ;;  %v111_v38 = vld [vmem:[#allocation2 + $0xe0] sm:$0xff]  ;;  %v118_v39 = vld [vmem:[#allocation2 + $0x118] sm:$0xff] }
  0x89   :  { %977 = vmatpush1.bf16.msra.mxu0 %v2296_v41  ;;  %v163_v41 = vld [vmem:[#allocation2 + $0x280] sm:$0xff] }
  0x8a   :  { %1047 = vmatprep.subr.bf16.mxu0 %v2299_v42  ;;  %v2383_v42 = vld [vmem:[#allocation5 + $0xb0] ss:$8 sps:$4 sm:$0xff]   ;;  %v212_v48 = vpack.c.bf16 %v163_v41, %v156_v40  ;;  %v2403_v40 = vld [vmem:[#allocation7 + $0x18] sm:$0xff]  }
  0x8b   :  { %868 = vmatpush1.bf16.msra.mxu1 %v2383_v42  ;;  %v126_v42 = vld [vmem:[#allocation2 + $0x158] sm:$0xff] }
  0x8c   :  { %979 = vmatmul.mubr.bf16.vlgmr.msra.gmra.mrb[0].mxu0 %v176_v49  ;;  %v2387_v49 = vld [vmem:[#allocation5 + $0xd4] ss:$8 sps:$4 sm:$0xff]   ;;  %869 = vmatprep.subr.bf16.mxu1 %v2384_v44 }
  0x8d   :  { %1048 = vmatpush1.bf16.msra.mxu0 %v2297_v50  ;;  %988 = vmatprep.mubr.bf16.mxu0 %v184_v51  ;;  %v2324_v50 = vld [vmem:[#allocation5 + $0x290] ss:$8 sps:$4 sm:$0xff]   ;;  %v155_v51 = vld [vmem:[#allocation2 + $0x240] sm:$0xff] }
  0x8e   :  { %1049 = vmatprep.subr.bf16.mxu0 %v2302_v52  ;;  %v162_v52 = vld [vmem:[#allocation2 + $0x278] sm:$0xff]  ;;  %v2404_v44 = vld [vmem:[#allocation7 + $0x60] sm:$0xff]  }
  0x8f   :  { %870 = vmatpush1.bf16.msra.mxu1 %v2386_v47  ;;  %v211_v59 = vpack.c.bf16 %v162_v52, %v155_v51  ;;  %v188_v47 = vpack.c.bf16 %v118_v39, %v111_v38  ;;  %v101_v51 = vld [vmem:[#allocation2 + $0x90] sm:$0xff]  ;;  %v108_v52 = vld [vmem:[#allocation2 + $0xc8] sm:$0xff]  ;;  %v2600_v38 = vmov 0  }
  0x90   :  { %871 = vmatprep.subr.bf16.mxu1 %v2387_v49  ;;  %v2405_v49 = vld [vmem:[#allocation7 + $0x20] sm:$0xff]   ;;  %v89_v39 = vld [vmem:[#allocation2 + $0x30] sm:$0xff] }
  0x91   :  { %1050 = vmatpush1.bf16.msra.mxu0 %v2300_v55  ;;  %v2389_v55 = vld [vmem:[#allocation5 + $0xd0] ss:$8 sps:$4 sm:$0xff]  }
  0x92   :  { %1051 = vmatprep.subr.bf16.mxu0 %v2305_v56  ;;  %v2390_v56 = vld [vmem:[#allocation5 + $0xe4] ss:$8 sps:$4 sm:$0xff]  }
  0x93   :  { %872 = vmatpush1.bf16.msra.mxu1 %v2389_v55  ;;  %v125_v55 = vld [vmem:[#allocation2 + $0x150] sm:$0xff] }
  0x94   :  { %989 = vmatmul.mubr.bf16.gmra.mrb[4].mxu0 %v183_v63  ;;  %873 = vmatprep.subr.bf16.mxu1 %v2390_v56  ;;  %v2330_v63 = vld [vmem:[#allocation5 + $0x2b0] ss:$8 sps:$4 sm:$0xff]  }
  0x95   :  { %1052 = vmatpush1.bf16.msra.mxu0 %v2303_v0  ;;  %998 = vmatprep.mubr.bf16.mxu0 %v191_v1  ;;  %v2335_v0 = vld [vmem:[#allocation5 + $0x2c4] ss:$8 sps:$4 sm:$0xff]   ;;  %v169_v1 = vld [vmem:[#allocation2 + $0x2b0] sm:$0xff]  ;;  %v132_v56 = vld [vmem:[#allocation2 + $0x188] sm:$0xff] }
  0x96   :  { %1053 = vmatprep.subr.bf16.mxu0 %v2308_v2  ;;  %v88_v2 = vld [vmem:[#allocation2 + $0x28] sm:$0xff]  ;;  %v218_v10 = vpack.c.bf16 %v169_v1, %v169_v1  ;;  %v122_v1 = vld [vmem:[#allocation2 + $0x138] sm:$0xff] }
  0x97   :  { %874 = vmatpush1.bf16.msra.mxu1 %v2392_v60  ;;  %v147_v60 = vld [vmem:[#allocation2 + $0x200] sm:$0xff] }
  0x98   :  { %875 = vmatprep.subr.bf16.mxu1 %v2393_v62  ;;  %v195_v62 = vpack.c.bf16 %v132_v56, %v125_v55  ;;  %v159_v56 = vld [vmem:[#allocation2 + $0x260] sm:$0xff] }
  0x99   :  { %1054 = vmatpush1.bf16.msra.mxu0 %v2306_v5  ;;  %v2333_v5 = vld [vmem:[#allocation5 + $0x2c0] ss:$8 sps:$4 sm:$0xff]  }
  0x9a   :  { %1055 = vmatprep.subr.bf16.mxu0 %v2311_v6  ;;  %v83_v6 = vld [vmem:[#allocation2] sm:$0xff] }
  0x9b   :  { %876 = vmatpush1.bf16.msra.mxu1 %v2395_v4  ;;  %v139_v4 = vld [vmem:[#allocation2 + $0x1c0] sm:$0xff] }
  0x9c   :  { %999 = vmatmul.mubr.bf16.gmra.mrb[8].mxu0 %v190_v13  ;;  %v179_v13 = vpack.c.bf16 %v95_v3, %v88_v2  ;;  %2010 = vmatprep.subr.bf16.mxu1 %v2396_v8  ;;  %v130_v2 = vld [vmem:[#allocation2 + $0x178] sm:$0xff]  ;;  %v137_v3 = vld [vmem:[#allocation2 + $0x1b0] sm:$0xff] }
  0x9d   :  { %1056 = vmatpush1.bf16.msra.mxu0 %v2309_v14  ;;  %1008 = vmatprep.mubr.bf16.mxu0 %v198_v15  ;;  %v2397_v14 = vld [vmem:[#allocation7] sm:$0xff]   ;;  %v174_v15 = vpack.c.bf16 %v90_v7, %v83_v6  ;;  %v154_v7 = vld [vmem:[#allocation2 + $0x238] sm:$0xff]  ;;  %v161_v8 = vld [vmem:[#allocation2 + $0x270] sm:$0xff] }
  0x9e   :  { %1057 = vmatprep.subr.bf16.mxu0 %v2314_v16  ;;  %v2398_v16 = vld [vmem:[#allocation7 + $0x48] sm:$0xff]   ;;  %v210_v11 = vpack.c.bf16 %v161_v8, %v154_v7 }
  0x9f   :  { %878 = vmatmul.mubr.bf16.vlgmr.msra.gmra.mrb[0].mxu1 %v174_v15  ;;  %v151_v15 = vld [vmem:[#allocation2 + $0x220] sm:$0xff] }
  0xa0   :  { %887 = vmatprep.mubr.bf16.mxu1 %v182_v18  ;;  %2011 = vmatpush3.bf16.msra.mxu1 %v2397_v14  ;;  %v144_v14 = vld [vmem:[#allocation2 + $0x1e8] sm:$0xff] }
  0xa1   :  { %1058 = vmatpush1.bf16.msra.mxu0 %v2312_v19  ;;  %v2346_v19 = vld [vmem:[#allocation5 + $0x2e4] ss:$8 sps:$4 sm:$0xff]   ;;  %2012 = vmatprep.subr.bf16.mxu1 %v2398_v16  ;;  %v153_v16 = vld [vmem:[#allocation2 + $0x230] sm:$0xff] }
  0xa2   :  { %1059 = vmatprep.subr.bf16.mxu0 %v2317_v20  ;;  %v97_v20 = vld [vmem:[#allocation2 + $0x70] sm:$0xff] }
  0xa3   :  { %v181_v28 = vpack.c.bf16 %v104_v21, %v97_v20  ;;  %v207_v20 = vpack.c.bf16 %v151_v15, %v144_v14 }
  0xa4   :  { %1009 = vmatmul.mubr.bf16.gmra.mrb[12].mxu0 %v197_v30  ;;  %2013 = vmatpush3.bf16.msra.mxu1 %v2399_v22  ;;  %v2401_v30 = vld [vmem:[#allocation7 + $0x10] sm:$0xff]  }
  0xa5   :  { %1060 = vmatpush1.bf16.msra.mxu0 %v2315_v31  ;;  %1018 = vmatprep.mubr.bf16.mxu0 %v205_v32  ;;  %v2402_v31 = vld [vmem:[#allocation7 + $0x58] sm:$0xff]   ;;  %v2350_v32 = vld [vmem:[#allocation5 + $0x2f0] ss:$8 sps:$4 sm:$0xff]  }
  0xa6   :  { %1061 = vmatprep.subr.bf16.mxu0 %v2320_v33  ;;  %2014 = vmatprep.subr.bf16.mxu1 %v2400_v25  ;;  %v87_v33 = vld [vmem:[#allocation2 + $0x20] sm:$0xff]  ;;  %v158_v25 = vld [vmem:[#allocation2 + $0x258] sm:$0xff] }
  0xa7   :  { %888 = vmatmul.mubr.bf16.gmra.mrb[4].mxu1 %v181_v28  ;;  %v178_v41 = vpack.c.bf16 %v94_v34, %v87_v33  ;;  %v206_v28 = vpack.c.bf16 %v150_v24, %v143_v23  ;;  %v172_v33 = vld [vmem:[#allocation2 + $0x2c8] sm:$0xff] }
  0xa8   :  { %897 = vmatprep.mubr.bf16.mxu1 %v189_v29  ;;  %2015 = vmatpush3.bf16.msra.mxu1 %v2401_v30 }
  0xa9   :  { %1062 = vmatpush1.bf16.msra.mxu0 %v2318_v36  ;;  %v102_v36 = vld [vmem:[#allocation2 + $0x98] sm:$0xff]  ;;  %2016 = vmatprep.subr.bf16.mxu1 %v2402_v31  ;;  %v157_v31 = vld [vmem:[#allocation2 + $0x250] sm:$0xff] }
  0xaa   :  { %1063 = vmatprep.subr.bf16.mxu0 %v2323_v37  ;;  %v109_v37 = vld [vmem:[#allocation2 + $0xd0] sm:$0xff] }
  0xac   :  { %1019 = vmatmul.mubr.bf16.gmra.mrb[16].mxu0 %v204_v46  ;;  %v186_v46 = vpack.c.bf16 %v109_v37, %v102_v36  ;;  %2017 = vmatpush3.bf16.msra.mxu1 %v2403_v40  ;;  %v171_v36 = vld [vmem:[#allocation2 + $0x2c0] sm:$0xff]  ;;  %v96_v40 = vld [vmem:[#allocation2 + $0x68] sm:$0xff] }
  0xad   :  { %1064 = vmatpush1.bf16.msra.mxu0 %v2321_v43  ;;  %1028 = vmatprep.mubr.bf16.mxu0 %v212_v48  ;;  %v133_v43 = vld [vmem:[#allocation2 + $0x190] sm:$0xff]  ;;  %v220_v37 = vpack.c.bf16 %v171_v36, %v171_v36 }
  0xae   :  { %1065 = vmatprep.subr.bf16.mxu0 %v2326_v45  ;;  %v2356_v45 = vld [vmem:[#allocation5 + $0x300] ss:$8 sps:$4 sm:$0xff]   ;;  %v196_v48 = vpack.c.bf16 %v133_v43, %v126_v42  ;;  %2018 = vmatprep.subr.bf16.mxu1 %v2404_v44 }
  0xaf   :  { %898 = vmatmul.mubr.bf16.gmra.mrb[8].mxu1 %v188_v47  ;;  %v103_v42 = vld [vmem:[#allocation2 + $0xa0] sm:$0xff]  ;;  %v110_v43 = vld [vmem:[#allocation2 + $0xd8] sm:$0xff] }
  0xb0   :  { %907 = vmatprep.mubr.bf16.mxu1 %v196_v48  ;;  %2019 = vmatpush3.bf16.msra.mxu1 %v2405_v49  ;;  %v187_v44 = vpack.c.bf16 %v110_v43, %v103_v42  ;;  %v2408_v48 = vld [vmem:[#allocation7 + $0x70] sm:$0xff]   ;;  %v131_v49 = vld [vmem:[#allocation2 + $0x180] sm:$0xff] }
  0xb1   :  { %1066 = vmatpush1.bf16.msra.mxu0 %v2324_v50  ;;  %v2406_v50 = vld [vmem:[#allocation7 + $0x68] sm:$0xff]  }
  0xb2   :  { %1067 = vmatprep.subr.bf16.mxu0 %v2329_v53  ;;  %v116_v53 = vld [vmem:[#allocation2 + $0x108] sm:$0xff]  ;;  %2020 = vmatprep.subr.bf16.mxu1 %v2406_v50  ;;  %v138_v50 = vld [vmem:[#allocation2 + $0x1b8] sm:$0xff] }
  0xb4   :  { %1029 = vmatmul.mubr.bf16.gmra.mrb[20].mxu0 %v211_v59  ;;  %v140_v59 = vld [vmem:[#allocation2 + $0x1c8] sm:$0xff] }
  0xb5   :  { %1068 = vmatpush1.bf16.msra.mxu0 %v2327_v57  ;;  %1038 = vmatprep.mubr.bf16.mxu0 %v219_v61  ;;  %v2407_v57 = vld [vmem:[#allocation7 + $0x28] sm:$0xff]   ;;  %v193_v61 = vpack.c.bf16 %v123_v54, %v116_v53  ;;  %v152_v54 = vld [vmem:[#allocation2 + $0x228] sm:$0xff] }
  0xb6   :  { %1069 = vmatprep.subr.bf16.mxu0 %v2332_v58  ;;  %v185_v58 = vpack.c.bf16 %v108_v52, %v101_v51  ;;  %2021 = vmatpush3.bf16.msra.mxu1 %v2407_v57  ;;  %v2409_v51 = vld [vmem:[#allocation7 + $0x30] sm:$0xff]   ;;  %v201_v52 = vpack.c.bf16 %v138_v50, %v131_v49  ;;  %v145_v53 = vld [vmem:[#allocation2 + $0x1f0] sm:$0xff] }
  0xb7   :  { %908 = vmatmul.mubr.bf16.gmra.mrb[12].mxu1 %v195_v62  ;;  %2022 = vmatprep.subr.bf16.mxu1 %v2408_v48  ;;  %v208_v55 = vpack.c.bf16 %v152_v54, %v145_v53  ;;  %v166_v57 = vld [vmem:[#allocation2 + $0x298] sm:$0xff]  ;;  %v2411_v62 = vld [vmem:[#allocation7 + $0x38] sm:$0xff]  }
  0xb9   :  { %1070 = vmatpush1.bf16.msra.mxu0 %v2330_v63  ;;  %v203_v63 = vpack.c.bf16 %v147_v60, %v140_v59  ;;  %v173_v59 = vld [vmem:[#allocation2 + $0x2d0] sm:$0xff] }
  0xba   :  { %1071 = vmatprep.subr.bf16.mxu0 %v2335_v0  ;;  %v115_v0 = vld [vmem:[#allocation2 + $0x100] sm:$0xff]  ;;  %2023 = vmatpush3.bf16.msra.mxu1 %v2409_v51  ;;  %v222_v60 = vpack.c.bf16 %v173_v59, %v173_v59 }
  0xbb   :  { %917 = vmatprep.mubr.bf16.mxu1 %v203_v63  ;;  %v192_v6 = vpack.c.bf16 %v122_v1, %v115_v0 }
  0xbc   :  { %1039 = vmatmul.mubr.bf16.gmra.mrb[24].mxu0 %v218_v10 }
  0xbd   :  { %1072 = vmatpush1.bf16.msra.mxu0 %v2333_v5  ;;  %1079 = vmatprep.mubr.bf16.mxu0 %v179_v13  ;;  %v146_v5 = vld [vmem:[#allocation2 + $0x1f8] sm:$0xff]  ;;  %v136_v13 = vld [vmem:[#allocation2 + $0x1a8] sm:$0xff] }
  0xbe   :  { %1073 = vmatprep.subr.bf16.mxu0 %v2340_v9  ;;  %v200_v9 = vpack.c.bf16 %v137_v3, %v130_v2  ;;  %v202_v10 = vpack.c.bf16 %v146_v5, %v139_v4  ;;  %v199_v18 = vpack.c.bf16 %v136_v13, %v129_v12  ;;  %v2601_v3 = vmov 0.0  }
  0xc0   :  { %918 = vmatmul.mubr.bf16.gmra.mrb[16].mxu1 %v202_v10 }
  0xc1   :  { %1074 = vmatpush1.bf16.msra.mxu0 %v2338_v17  ;;  %927 = vmatprep.mubr.bf16.mxu1 %v210_v11  ;;  %v160_v17 = vld [vmem:[#allocation2 + $0x268] sm:$0xff] }
  0xc2   :  { %1075 = vmatprep.subr.bf16.mxu0 %v2346_v19  ;;  %v168_v19 = vld [vmem:[#allocation2 + $0x2a8] sm:$0xff]  ;;  %v209_v21 = vpack.c.bf16 %v160_v17, %v153_v16 }
  0xc3   :  { %v217_v22 = vpack.c.bf16 %v168_v19, %v168_v19 }
  0xc5   :  { %1076 = vmatpush1.bf16.msra.mxu0 %v2344_v26  ;;  %v165_v26 = vld [vmem:[#allocation2 + $0x290] sm:$0xff] }
  0xc6   :  { %1077 = vmatprep.subr.bf16.mxu0 %v2352_v27  ;;  %v167_v27 = vld [vmem:[#allocation2 + $0x2a0] sm:$0xff]  ;;  %v214_v29 = vpack.c.bf16 %v165_v26, %v158_v25 }
  0xc7   :  { %v216_v30 = vpack.c.bf16 %v167_v27, %v167_v27  ;;  %v323_v27 = vlaneseq }
  0xc8   :  { %928 = vmatmul.mubr.bf16.gmra.mrb[20].mxu1 %v209_v21 }
  0xc9   :  { %1078 = vmatpush1.bf16.msra.mxu0 %v2350_v32  ;;  %937 = vmatprep.mubr.bf16.mxu1 %v217_v22  ;;  %v164_v32 = vld [vmem:[#allocation2 + $0x288] sm:$0xff] }
  0xca   :  { %1148 = vmatprep.subr.bf16.mxu0 %v2358_v35  ;;  %v213_v34 = vpack.c.bf16 %v164_v32, %v157_v31  ;;  %v221_v35 = vpack.c.bf16 %v172_v33, %v172_v33  ;;  %v321_v31 = vld [vmem:[%s2864_s2] sm:$0x3] }
  0xcc   :  { %1080 = vmatmul.mubr.bf16.vlgmr.msra.gmra.mrb[0].mxu0 %v178_v41  ;;  %v180_v41 = vpack.c.bf16 %v96_v40, %v89_v39 }
  0xcd   :  { %1149 = vmatpush1.bf16.msra.mxu0 %v2356_v45  ;;  %1089 = vmatprep.mubr.bf16.mxu0 %v186_v46  ;;  %v117_v45 = vld [vmem:[#allocation2 + $0x110] sm:$0xff]  ;;  %v124_v46 = vld [vmem:[#allocation2 + $0x148] sm:$0xff] }
  0xce   :  { %v194_v47 = vpack.c.bf16 %v124_v46, %v117_v45 }
  0xd0   :  { %938 = vmatmul.mubr.bf16.gmra.mrb[24].mxu1 %v216_v30 }
  0xd4   :  { %1090 = vmatmul.mubr.bf16.gmra.mrb[4].mxu0 %v185_v58  ;;  %v215_v58 = vpack.c.bf16 %v166_v57, %v159_v56 }
  0xd5   :  { %1099 = vmatprep.mubr.bf16.mxu0 %v193_v61  ;;  %v2410_v61 = vld [vmem:[#allocation7 + $0x78] sm:$0xff]  }
  0xd6   :  { %2024 = vmatprep.subr.bf16.mxu1 %v2410_v61 }
  0xd7   :  { %2025 = vmatpush3.bf16.msra.mxu1 %v2411_v62 }
  0xd8   :  { %2083 = vmatprep.subr.bf16.mxu1 %v2601_v3 }
  0xdc   :  { %1100 = vmatmul.mubr.bf16.gmra.mrb[8].mxu0 %v192_v6 }
  0xdd   :  { %1109 = vmatprep.mubr.bf16.mxu0 %v200_v9 }
  0xe4   :  { %1110 = vmatmul.mubr.bf16.gmra.mrb[12].mxu0 %v199_v18 }
  0xe5   :  { %1119 = vmatprep.mubr.bf16.mxu0 %v207_v20 }
  0xec   :  { %1120 = vmatmul.mubr.bf16.gmra.mrb[16].mxu0 %v206_v28 }
  0xed   :  { %1129 = vmatprep.mubr.bf16.mxu0 %v214_v29  ;;  %v324_v29 = vshrl.u32 %v323_v27, 7 }
  0xef   :  { %v325_v30 = vsub.s32 0, %v324_v29  ;;  %v329_v32 = vsub.s32 1, %v324_v29 }
  0xf1   :  { %v2742_v33 = vrot.slane %v321_v31, %v325_v30  ;;  %v2413_v30 = vld [vmem:[#allocation8 + $0x8] sm:$0xff]  }
  0xf4   :  { %1130 = vmatmul.mubr.bf16.gmra.mrb[20].mxu0 %v213_v34  ;;  %v2744_v34 = vrot.slane %v321_v31, %v329_v32 }
  0xf5   :  { %1139 = vmatprep.mubr.bf16.mxu0 %v221_v35 }
  0xfc   :  { %1140 = vmatmul.mubr.bf16.gmra.mrb[24].mxu0 %v220_v37 }
  0xfd   :  { %1180 = vmatprep.mubr.bf16.mxu0 %v2600_v38 }
 0x104   :  { %1977 = vmatmul.mubr.msk.bf16.vlgmr.msra.gmra.mrb[0].mxu0 %vm823_vm0, %v180_v41 }
 0x105   :  { %1190 = vmatprep.mubr.bf16.mxu0 %v2600_v38 }
 0x10c   :  { %1978 = vmatmul.mubr.msk.bf16.gmra.mrb[4].mxu0 %vm823_vm0, %v187_v44 }
 0x10d   :  { %1200 = vmatprep.mubr.bf16.mxu0 %v2600_v38 }
 0x114   :  { %1979 = vmatmul.mubr.msk.bf16.gmra.mrb[8].mxu0 %vm823_vm0, %v194_v47 }
 0x115   :  { %1210 = vmatprep.mubr.bf16.mxu0 %v2600_v38 }
 0x11c   :  { %1980 = vmatmul.mubr.msk.bf16.gmra.mrb[12].mxu0 %vm823_vm0, %v201_v52 }
 0x11d   :  { %1220 = vmatprep.mubr.bf16.mxu0 %v2600_v38 }
 0x124   :  { %1981 = vmatmul.mubr.msk.bf16.gmra.mrb[16].mxu0 %vm823_vm0, %v208_v55 }
 0x125   :  { %1230 = vmatprep.mubr.bf16.mxu0 %v2600_v38 }
 0x12c   :  { %1982 = vmatmul.mubr.msk.bf16.gmra.mrb[20].mxu0 %vm823_vm0, %v215_v58 }
 0x12d   :  { %1240 = vmatprep.mubr.bf16.mxu0 %v2600_v38 }
 0x134   :  { %1983 = vmatmul.mubr.msk.bf16.gmra.mrb[24].mxu0 %vm823_vm0, %v222_v60 }
 0x172   :  { %v879_v63 = vpop.f32.mrb[0].mxu1 }
 0x173   :  { %v881_v0 = vpop.f32.mrb[1].mxu1  ;;  %v880_v35 = vadd.f32 %v879_v63, %v2742_v33  ;;  %v2412_v63 = vld [vmem:[#allocation8] sm:$0xff]  }
 0x174   :  { %v883_v1 = vpop.f32.mrb[2].mxu1  ;;  %v882_v36 = vadd.f32 %v881_v0, %v2744_v34 }
 0x175   :  { %v885_v2 = vpop.f32.mrb[3].mxu1  ;;  %v884_v38 = vadd.f32 %v883_v1, %v2742_v33 }
 0x176   :  { %v886_v41 = vadd.f32 %v885_v2, %v2744_v34 }
 0x17a   :  { %v889_v4 = vpop.f32.mrb[4].mxu1 }
 0x17b   :  { %v891_v5 = vpop.f32.mrb[5].mxu1  ;;  %v890_v50 = vadd.f32 %v889_v4, %v2742_v33 }
 0x17c   :  { %v893_v6 = vpop.f32.mrb[6].mxu1  ;;  %v892_v52 = vadd.f32 %v891_v5, %v2744_v34 }
 0x17d   :  { %v895_v7 = vpop.f32.mrb[7].mxu1  ;;  %v894_v59 = vadd.f32 %v893_v6, %v2742_v33 }
 0x17e   :  { %v896_v0 = vadd.f32 %v895_v7, %v2744_v34 }
 0x182   :  { %v2703_v8 = vpop.f32.mrb[8].mxu1 }
 0x183   :  { %v2705_v9 = vpop.f32.mrb[9].mxu1  ;;  %v900_v6 = vadd.f32 %v2703_v8, %v2742_v33 }
 0x184   :  { %v2707_v10 = vpop.f32.mrb[10].mxu1  ;;  %v902_v31 = vadd.f32 %v2705_v9, %v2744_v34 }
 0x185   :  { %v2709_v11 = vpop.f32.mrb[11].mxu1 }
 0x18a   :  { %v2711_v12 = vpop.f32.mrb[12].mxu1 }
 0x18b   :  { %v2713_v13 = vpop.f32.mrb[13].mxu1 }
 0x18c   :  { %v2715_v14 = vpop.f32.mrb[14].mxu1 }
 0x18d   :  { %v2717_v15 = vpop.f32.mrb[15].mxu1 }
 0x193   :  { %v2719_v16 = vpop.f32.mrb[16].mxu1 }
 0x194   :  { %v2721_v17 = vpop.f32.mrb[17].mxu1 }
 0x195   :  { %v2723_v18 = vpop.f32.mrb[18].mxu1 }
 0x196   :  { %v2725_v19 = vpop.f32.mrb[19].mxu1 }
 0x19b   :  { %v2727_v20 = vpop.f32.mrb[20].mxu1 }
 0x19c   :  { %v2729_v21 = vpop.f32.mrb[21].mxu1 }
 0x19d   :  { %v2731_v22 = vpop.f32.mrb[22].mxu1 }
 0x19e   :  { %v2733_v23 = vpop.f32.mrb[23].mxu1 }
 0x1a3   :  { %v2735_v24 = vpop.f32.mrb[24].mxu1 }
 0x1a4   :  { %v2737_v25 = vpop.f32.mrb[25].mxu1 }
 0x1a5   :  { %v943_v26 = vpop.f32.mrb[26].mxu1 }
 0x1a6   :  { %v944_v28 = vpop.f32.mrb[27].mxu1 }
 0x1d7   :  { %v1182_v37 = vpop.f32.mrb[0].mxu0 }
 0x1d8   :  { %v2128_v39 = vadd.f32 %v1182_v37, %v880_v35  ;;  %v1184_v40 = vpop.f32.mrb[1].mxu0 }
 0x1d9   :  { %v2130_v42 = vadd.f32 %v1184_v40, %v882_v36  ;;  %v1186_v43 = vpop.f32.mrb[2].mxu0  ;;  %v904_v40 = vadd.f32 %v2707_v10, %v2742_v33 }
 0x1da   :  { %v1275_v44 = vmul.f32 0.2, %v2128_v39  ;;  %v2132_v45 = vadd.f32 %v1186_v43, %v884_v38  ;;  %v1188_v46 = vpop.f32.mrb[3].mxu0  ;;  %vm1249_vm1 = vcmp.gt.f32.partialorder %v2128_v39, 0.0  ;;  %v2414_v43 = vld [vmem:[#allocation8 + $0x10] sm:$0xff]  }
 0x1db   :  { %v1276_v47 = vmul.f32 0.2, %v2130_v42  ;;  %v2134_v48 = vadd.f32 %v1188_v46, %v886_v41  ;;  %vm1250_vm2 = vcmp.gt.f32.partialorder %v2130_v42, 0.0 }
 0x1dc   :  { %vm1251_vm3 = vcmp.gt.f32.partialorder %v2132_v45, 0.0  ;;  %v1277_v49 = vmul.f32 0.2, %v2132_v45  ;;  %v1301_v53 = vsel %vm1249_vm1, %v2128_v39, %v1275_v44  ;;  %v906_v44 = vadd.f32 %v2709_v11, %v2744_v34  ;;  %v2415_v11 = vld [vmem:[#allocation8 + $0x18] sm:$0xff]  }
 0x1dd   :  { %vm1252_vm4 = vcmp.gt.f32.partialorder %v2134_v48, 0.0  ;;  %v1278_v51 = vmul.f32 0.2, %v2134_v48  ;;  %v1302_v57 = vsel %vm1250_vm2, %v2130_v42, %v1276_v47 }
 0x1de   :  { %v1303_v54 = vsel %vm1251_vm3, %v2132_v45, %v1277_v49 }
 0x1df   :  { %v1327_v55 = vpack.c.bf16 %v1303_v54, %v1301_v53  ;;  %v1192_v56 = vpop.f32.mrb[4].mxu0  ;;  %v1304_v58 = vsel %vm1252_vm4, %v2134_v48, %v1278_v51  ;;  %v910_v51 = vadd.f32 %v2711_v12, %v2742_v33  ;;  %v912_v53 = vadd.f32 %v2713_v13, %v2744_v34 }
 0x1e0   :  { %v2136_v60 = vadd.f32 %v1192_v56, %v890_v50  ;;  %v1194_v61 = vpop.f32.mrb[5].mxu0  ;;  %v1328_v62 = vpack.c.bf16 %v1304_v58, %v1302_v57 }
 0x1e1   :  { %v2138_v1 = vadd.f32 %v1194_v61, %v892_v52  ;;  %v1196_v2 = vpop.f32.mrb[6].mxu0 }
 0x1e2   :  { %v1279_v4 = vmul.f32 0.2, %v2136_v60  ;;  %v2140_v26 = vadd.f32 %v1196_v2, %v894_v59  ;;  %v1198_v27 = vpop.f32.mrb[7].mxu0  ;;  %1508 = vmatprep.mubr.bf16.mxu1 %v1328_v62  ;;  %vm1253_vm5 = vcmp.gt.f32.partialorder %v2136_v60, 0.0 }
 0x1e3   :  { %v1280_v5 = vmul.f32 0.2, %v2138_v1  ;;  %v2142_v28 = vadd.f32 %v1198_v27, %v896_v0  ;;  %1509 = vmatmul.mubr.bf16.vlgmr.msra.gmra.mrb[28].mxu1 %v1327_v55  ;;  %vm1254_vm6 = vcmp.gt.f32.partialorder %v2138_v1, 0.0  ;;  %v916_v0 = vadd.f32 %v2717_v15, %v2744_v34  ;;  %v2417_v15 = vld [vmem:[#allocation8 + $0x28] sm:$0xff]  }
 0x1e4   :  { %vm1255_vm7 = vcmp.gt.f32.partialorder %v2140_v26, 0.0  ;;  %v1281_v29 = vmul.f32 0.2, %v2140_v26  ;;  %2084 = vmatpush3.bf16.msra.mxu1 %v2412_v63  ;;  %v1305_v32 = vsel %vm1253_vm5, %v2136_v60, %v1279_v4  ;;  %v914_v60 = vadd.f32 %v2715_v14, %v2742_v33  ;;  %v2416_v63 = vld [vmem:[#allocation8 + $0x20] sm:$0xff]  }
 0x1e5   :  { %vm1256_vm8 = vcmp.gt.f32.partialorder %v2142_v28, 0.0  ;;  %v1282_v7 = vmul.f32 0.2, %v2142_v28  ;;  %2085 = vmatprep.subr.bf16.mxu1 %v2601_v3  ;;  %v1306_v37 = vsel %vm1254_vm6, %v2138_v1, %v1280_v5 }
 0x1e6   :  { %v1307_v35 = vsel %vm1255_vm7, %v2140_v26, %v1281_v29 }
 0x1e7   :  { %v1202_v36 = vpop.f32.mrb[8].mxu0  ;;  %v1308_v38 = vsel %vm1256_vm8, %v2142_v28, %v1282_v7  ;;  %v1329_v39 = vpack.c.bf16 %v1307_v35, %v1305_v32  ;;  %v920_v28 = vadd.f32 %v2719_v16, %v2742_v33 }
 0x1e8   :  { %v2144_v41 = vadd.f32 %v1202_v36, %v900_v6  ;;  %v1204_v8 = vpop.f32.mrb[9].mxu0  ;;  %v1330_v42 = vpack.c.bf16 %v1308_v38, %v1306_v37  ;;  %2086 = vmatpush3.bf16.msra.mxu1 %v2413_v30  ;;  %v922_v6 = vadd.f32 %v2721_v17, %v2744_v34  ;;  %v924_v37 = vadd.f32 %v2723_v18, %v2742_v33 }
 0x1e9   :  { %v2146_v9 = vadd.f32 %v1204_v8, %v902_v31  ;;  %v1206_v45 = vpop.f32.mrb[10].mxu0  ;;  %2087 = vmatprep.subr.bf16.mxu1 %v2601_v3 }
 0x1ea   :  { %v1283_v46 = vmul.f32 0.2, %v2144_v41  ;;  %v2148_v47 = vadd.f32 %v1206_v45, %v904_v40  ;;  %v1208_v48 = vpop.f32.mrb[11].mxu0  ;;  %1516 = vmatprep.mubr.bf16.mxu1 %v1330_v42  ;;  %vm1257_vm9 = vcmp.gt.f32.partialorder %v2144_v41, 0.0  ;;  %v926_v40 = vadd.f32 %v2725_v19, %v2744_v34 }
 0x1eb   :  { %v1284_v49 = vmul.f32 0.2, %v2146_v9  ;;  %v2150_v50 = vadd.f32 %v1208_v48, %v906_v44  ;;  %1517 = vmatmul.mubr.bf16.gmra.mrb[32].mxu1 %v1329_v39  ;;  %vm1258_vm10 = vcmp.gt.f32.partialorder %v2146_v9, 0.0  ;;  %v930_v45 = vadd.f32 %v2727_v20, %v2742_v33 }
 0x1ec   :  { %vm1259_vm11 = vcmp.gt.f32.partialorder %v2148_v47, 0.0  ;;  %v1285_v10 = vmul.f32 0.2, %v2148_v47  ;;  %2088 = vmatpush3.bf16.msra.mxu1 %v2414_v43  ;;  %v1309_v54 = vsel %vm1257_vm9, %v2144_v41, %v1283_v46  ;;  %v932_v46 = vadd.f32 %v2729_v21, %v2744_v34 }
 0x1ed   :  { %vm1260_vm12 = vcmp.gt.f32.partialorder %v2150_v50, 0.0  ;;  %v1286_v52 = vmul.f32 0.2, %v2150_v50  ;;  %2089 = vmatprep.subr.bf16.mxu1 %v2601_v3  ;;  %v1310_v57 = vsel %vm1258_vm10, %v2146_v9, %v1284_v49  ;;  %v936_v20 = vadd.f32 %v2733_v23, %v2744_v34 }
 0x1ee   :  { %v1311_v55 = vsel %vm1259_vm11, %v2148_v47, %v1285_v10  ;;  %v942_v23 = vadd.f32 %v2737_v25, %v2744_v34  ;;  %vm2602_vm11 = vmmov 0  }
 0x1ef   :  { %v1212_v56 = vpop.f32.mrb[12].mxu0  ;;  %v1312_v58 = vsel %vm1260_vm12, %v2150_v50, %v1286_v52  ;;  %v1331_v59 = vpack.c.bf16 %v1311_v55, %v1309_v54 }
 0x1f0   :  { %v2152_v61 = vadd.f32 %v1212_v56, %v910_v51  ;;  %v1214_v12 = vpop.f32.mrb[13].mxu0  ;;  %v1332_v62 = vpack.c.bf16 %v1312_v58, %v1310_v57  ;;  %2090 = vmatpush3.bf16.msra.mxu1 %v2415_v11  ;;  %v934_v11 = vadd.f32 %v2731_v22, %v2742_v33  ;;  %v940_v22 = vadd.f32 %v2735_v24, %v2742_v33 }
 0x1f1   :  { %v2154_v13 = vadd.f32 %v1214_v12, %v912_v53  ;;  %v1216_v1 = vpop.f32.mrb[14].mxu0  ;;  %2091 = vmatprep.subr.bf16.mxu1 %v2601_v3 }
 0x1f2   :  { %v1287_v2 = vmul.f32 0.2, %v2152_v61  ;;  %v2156_v4 = vadd.f32 %v1216_v1, %v914_v60  ;;  %v1218_v26 = vpop.f32.mrb[15].mxu0  ;;  %1524 = vmatprep.mubr.bf16.mxu1 %v1332_v62  ;;  %vm1261_vm13 = vcmp.gt.f32.partialorder %v2152_v61, 0.0 }
 0x1f3   :  { %v1288_v27 = vmul.f32 0.2, %v2154_v13  ;;  %v2158_v5 = vadd.f32 %v1218_v26, %v916_v0  ;;  %1525 = vmatmul.mubr.bf16.gmra.mrb[36].mxu1 %v1331_v59  ;;  %vm1262_vm14 = vcmp.gt.f32.partialorder %v2154_v13, 0.0 }
 0x1f4   :  { %vm1263_vm15 = vcmp.gt.f32.partialorder %v2156_v4, 0.0  ;;  %v1289_v14 = vmul.f32 0.2, %v2156_v4  ;;  %2092 = vmatpush3.bf16.msra.mxu1 %v2416_v63  ;;  %v1313_v30 = vsel %vm1261_vm13, %v2152_v61, %v1287_v2 }
 0x1f5   :  { %vm1264_vm0 = vcmp.gt.f32.partialorder %v2158_v5, 0.0  ;;  %v1290_v29 = vmul.f32 0.2, %v2158_v5  ;;  %2093 = vmatprep.subr.bf16.mxu1 %v2601_v3  ;;  %v1314_v32 = vsel %vm1262_vm14, %v2154_v13, %v1288_v27 }
 0x1f6   :  { %v1315_v7 = vsel %vm1263_vm15, %v2156_v4, %v1289_v14 }
 0x1f7   :  { %v1222_v31 = vpop.f32.mrb[16].mxu0  ;;  %v1316_v35 = vsel %vm1264_vm0, %v2158_v5, %v1290_v29  ;;  %v1333_v36 = vpack.c.bf16 %v1315_v7, %v1313_v30  ;;  %v2419_v30 = vld [vmem:[#allocation8 + $0x38] sm:$0xff]  }
 0x1f8   :  { %v2160_v38 = vadd.f32 %v1222_v31, %v920_v28  ;;  %v1224_v16 = vpop.f32.mrb[17].mxu0  ;;  %v1334_v39 = vpack.c.bf16 %v1316_v35, %v1314_v32  ;;  %2094 = vmatpush3.bf16.msra.mxu1 %v2417_v15  ;;  %v2802_v31 = vld [vmem:[%s2866_s4] ss:$0 sm:$0xff] }
 0x1f9   :  { %v2162_v41 = vadd.f32 %v1224_v16, %v922_v6  ;;  %v1226_v17 = vpop.f32.mrb[18].mxu0  ;;  %2095 = vmatprep.subr.bf16.mxu1 %v2601_v3  ;;  %v2418_v6 = vld [vmem:[#allocation8 + $0x30] sm:$0xff]  }
 0x1fa   :  { %v1291_v8 = vmul.f32 0.2, %v2160_v38  ;;  %v2164_v42 = vadd.f32 %v1226_v17, %v924_v37  ;;  %v1228_v43 = vpop.f32.mrb[19].mxu0  ;;  %1532 = vmatprep.mubr.bf16.mxu1 %v1334_v39  ;;  %vm1265_vm1 = vcmp.gt.f32.partialorder %v2160_v38, 0.0 }
 0x1fb   :  { %v1292_v44 = vmul.f32 0.2, %v2162_v41  ;;  %v2166_v9 = vadd.f32 %v1228_v43, %v926_v40  ;;  %1533 = vmatmul.mubr.bf16.gmra.mrb[40].mxu1 %v1333_v36  ;;  %vm1266_vm2 = vcmp.gt.f32.partialorder %v2162_v41, 0.0 }
 0x1fc   :  { %vm1267_vm3 = vcmp.gt.f32.partialorder %v2164_v42, 0.0  ;;  %v1293_v18 = vmul.f32 0.2, %v2164_v42  ;;  %v1317_v47 = vsel %vm1265_vm1, %v2160_v38, %v1291_v8  ;;  %2096 = vmatpush3.bf16.msra.mxu1 %v2418_v6 }
 0x1fd   :  { %vm1268_vm4 = vcmp.gt.f32.partialorder %v2166_v9, 0.0  ;;  %v1294_v19 = vmul.f32 0.2, %v2166_v9  ;;  %v1318_v50 = vsel %vm1266_vm2, %v2162_v41, %v1292_v44  ;;  %2097 = vmatprep.subr.bf16.mxu1 %v2601_v3 }
 0x1fe   :  { %v1319_v48 = vsel %vm1267_vm3, %v2164_v42, %v1293_v18 }
 0x1ff   :  { %v1232_v49 = vpop.f32.mrb[20].mxu0  ;;  %v1320_v10 = vsel %vm1268_vm4, %v2166_v9, %v1294_v19  ;;  %v1335_v51 = vpack.c.bf16 %v1319_v48, %v1317_v47 }
 0x200   :  { %v2168_v52 = vadd.f32 %v1232_v49, %v930_v45  ;;  %v1234_v53 = vpop.f32.mrb[21].mxu0  ;;  %v1336_v54 = vpack.c.bf16 %v1320_v10, %v1318_v50  ;;  %2098 = vmatpush3.bf16.msra.mxu1 %v2419_v30 }
 0x201   :  { %v2170_v55 = vadd.f32 %v1234_v53, %v932_v46  ;;  %v1236_v56 = vpop.f32.mrb[22].mxu0 }
 0x202   :  { %v1295_v57 = vmul.f32 0.2, %v2168_v52  ;;  %v2172_v58 = vadd.f32 %v1236_v56, %v934_v11  ;;  %v1238_v21 = vpop.f32.mrb[23].mxu0  ;;  %1540 = vmatprep.mubr.bf16.mxu1 %v1336_v54  ;;  %vm1269_vm5 = vcmp.gt.f32.partialorder %v2168_v52, 0.0 }
 0x203   :  { %v1296_v59 = vmul.f32 0.2, %v2170_v55  ;;  %v2174_v60 = vadd.f32 %v1238_v21, %v936_v20  ;;  %1541 = vmatmul.mubr.bf16.gmra.mrb[44].mxu1 %v1335_v51  ;;  %vm1270_vm6 = vcmp.gt.f32.partialorder %v2170_v55, 0.0 }
 0x204   :  { %vm1271_vm7 = vcmp.gt.f32.partialorder %v2172_v58, 0.0  ;;  %v1297_v61 = vmul.f32 0.2, %v2172_v58  ;;  %v1321_v62 = vsel %vm1269_vm5, %v2168_v52, %v1295_v57 }
 0x205   :  { %vm1272_vm8 = vcmp.gt.f32.partialorder %v2174_v60, 0.0  ;;  %v1298_v12 = vmul.f32 0.2, %v2174_v60  ;;  %v1322_v13 = vsel %vm1270_vm6, %v2170_v55, %v1296_v59 }
 0x206   :  { %v1323_v63 = vsel %vm1271_vm7, %v2172_v58, %v1297_v61 }
 0x207   :  { %v1242_v0 = vpop.f32.mrb[24].mxu0  ;;  %v1324_v1 = vsel %vm1272_vm8, %v2174_v60, %v1298_v12  ;;  %v1337_v2 = vpack.c.bf16 %v1323_v63, %v1321_v62 }
 0x208   :  { %v2176_v4 = vadd.f32 %v1242_v0, %v940_v22  ;;  %v1244_v26 = vpop.f32.mrb[25].mxu0  ;;  %v1338_v27 = vpack.c.bf16 %v1324_v1, %v1322_v13 }
 0x209   :  { %v2178_v5 = vadd.f32 %v1244_v26, %v942_v23  ;;  %v1246_v14 = vpop.f32.mrb[26].mxu0 }
 0x20a   :  { %v1299_v28 = vmul.f32 0.2, %v2176_v4  ;;  %v1247_v15 = vpop.f32.mrb[27].mxu0  ;;  %1548 = vmatprep.mubr.bf16.mxu1 %v1338_v27  ;;  %vm1273_vm9 = vcmp.gt.f32.partialorder %v2176_v4, 0.0 }
 0x20b   :  { %vm1274_vm10 = vcmp.gt.f32.partialorder %v2178_v5, 0.0  ;;  %v1300_v24 = vmul.f32 0.2, %v2178_v5  ;;  %1549 = vmatmul.mubr.bf16.gmra.mrb[48].mxu1 %v1337_v2 }
 0x20c   :  { %v1325_v34 = vsel %vm1273_vm9, %v2176_v4, %v1299_v28 }
 0x20d   :  { %v1326_v33 = vsel %vm1274_vm10, %v2178_v5, %v1300_v24  ;;  %v1339_v29 = vpack.c.bf16 %v1325_v34, %v1325_v34 }
 0x20e   :  { %v1340_v25 = vpack.c.bf16 %v1326_v33, %v1326_v33 }
 0x210   :  { %1556 = vmatprep.mubr.bf16.mxu1 %v1340_v25 }
 0x213   :  { %1557 = vmatmul.mubr.bf16.gmra.mrb[52].mxu1 %v1339_v29 }
 0x214   :  { %2099 = vmatprep.mubr.msk.bf16.mxu1 %vm2602_vm11, %v2601_v3 }
 0x2b6   :  { %v2026_v7 = vpop.f32.mrb[28].mxu1 }
 0x2b7   :  { %v2027_v32 = vpop.f32.mrb[29].mxu1 }
 0x2b8   :  { %v2028_v35 = vadd.f32 %v2027_v32, %v2026_v7  ;;  %v2029_v36 = vpop.f32.mrb[30].mxu1 }
 0x2b9   :  { %v2030_v37 = vpop.f32.mrb[31].mxu1 }
 0x2ba   :  { %v1511_v38 = vadd.f32 %v2028_v35, %v2802_v31  ;;  %v2031_v16 = vadd.f32 %v2030_v37, %v2029_v36 }
 0x2bc   :  { %v1577_v39 = vmul.f32 0.2, %v1511_v38  ;;  %v1514_v40 = vadd.f32 %v2031_v16, %v2802_v31  ;;  %vm1564_vm12 = vcmp.gt.f32.partialorder %v1511_v38, 0.0 }
 0x2be   :  { %vm1565_vm13 = vcmp.gt.f32.partialorder %v1514_v40, 0.0  ;;  %v1578_v41 = vmul.f32 0.2, %v1514_v40  ;;  %v2032_v17 = vpop.f32.mrb[32].mxu1  ;;  %v1590_v42 = vsel %vm1564_vm12, %v1511_v38, %v1577_v39 }
 0x2bf   :  { %v2033_v8 = vpop.f32.mrb[33].mxu1 }
 0x2c0   :  { %v1591_v43 = vsel %vm1565_vm13, %v1514_v40, %v1578_v41  ;;  %v2034_v44 = vadd.f32 %v2033_v8, %v2032_v17  ;;  %v2035_v9 = vpop.f32.mrb[34].mxu1 }
 0x2c1   :  { %v1603_v18 = vpack.c.bf16 %v1591_v43, %v1590_v42  ;;  %v2036_v45 = vpop.f32.mrb[35].mxu1 }
 0x2c2   :  { %v1519_v19 = vadd.f32 %v2034_v44, %v2802_v31  ;;  %v2037_v46 = vadd.f32 %v2036_v45, %v2035_v9 }
 0x2c3   :  { %2100 = vmatmul.mubr.bf16.vlgmr.msra.gmra.mrb[56].mxu1 %v1603_v18 }
 0x2c4   :  { %v1579_v47 = vmul.f32 0.2, %v1519_v19  ;;  %v1522_v48 = vadd.f32 %v2037_v46, %v2802_v31  ;;  %2103 = vmatprep.mubr.msk.bf16.mxu1 %vm2602_vm11, %v2601_v3  ;;  %vm1566_vm14 = vcmp.gt.f32.partialorder %v1519_v19, 0.0 }
 0x2c6   :  { %vm1567_vm15 = vcmp.gt.f32.partialorder %v1522_v48, 0.0  ;;  %v1580_v49 = vmul.f32 0.2, %v1522_v48  ;;  %v2038_v50 = vpop.f32.mrb[36].mxu1  ;;  %v1592_v52 = vsel %vm1566_vm14, %v1519_v19, %v1579_v47 }
 0x2c7   :  { %v2039_v10 = vpop.f32.mrb[37].mxu1 }
 0x2c8   :  { %v2040_v51 = vadd.f32 %v2039_v10, %v2038_v50  ;;  %v2041_v11 = vpop.f32.mrb[38].mxu1  ;;  %v1593_v53 = vsel %vm1567_vm15, %v1522_v48, %v1580_v49 }
 0x2c9   :  { %v2042_v54 = vpop.f32.mrb[39].mxu1  ;;  %v1604_v20 = vpack.c.bf16 %v1593_v53, %v1592_v52 }
 0x2ca   :  { %v1527_v55 = vadd.f32 %v2040_v51, %v2802_v31  ;;  %v2043_v56 = vadd.f32 %v2042_v54, %v2041_v11  ;;  %v2832_v51 = vld [vmem:[%s2868_s6] ss:$0 sm:$0xff]  ;;  %s2603_s6 = smov [#allocation10]  }
 0x2cb   :  { %2104 = vmatmul.mubr.bf16.gmra.mrb[60].mxu1 %v1604_v20  ;;  %s1865_s10 = sshll.u32 %s2603_s6, 4  ;;  %s1866_s10 = int_to_ptr.vmem [resolvable:$true] %s1865_s10 }
 0x2cc   :  { %v1581_v57 = vmul.f32 0.2, %v1527_v55  ;;  %v1530_v58 = vadd.f32 %v2043_v56, %v2802_v31  ;;  %2107 = vmatprep.mubr.msk.bf16.mxu1 %vm2602_vm11, %v2601_v3  ;;  %vm1568_vm0 = vcmp.gt.f32.partialorder %v1527_v55, 0.0  ;;  %s2560_s13 = scalar_lea.vmem %s1866_s10, 1664  ;;  %p2565_p5 = scmp.lt.s32.totalorder %s1866_s10, %s1866_s10 }
 0x2cd   :  { %p2561_p4 = scmp.ne.s32.totalorder %s1866_s10, %s2560_s13  ;;  %p2566_p6 = scmp.lt.s32.totalorder %s2560_s13, %s2560_s13 }
 0x2ce   :  { %vm1569_vm1 = vcmp.gt.f32.partialorder %v1530_v58, 0.0  ;;  %v1582_v21 = vmul.f32 0.2, %v1530_v58  ;;  %v2044_v59 = vpop.f32.mrb[40].mxu1  ;;  %v1594_v12 = vsel %vm1568_vm0, %v1527_v55, %v1581_v57 }
 0x2cf   :  { %v2045_v60 = vpop.f32.mrb[41].mxu1  ;;  %p2567_p7 = por %p2566_p6, %p2565_p5 }
 0x2d0   :  { %v2046_v61 = vadd.f32 %v2045_v60, %v2044_v59  ;;  %v2047_v22 = vpop.f32.mrb[42].mxu1  ;;  %v1595_v23 = vsel %vm1569_vm1, %v1530_v58, %v1582_v21 }
 0x2d1   :  { %v2048_v62 = vpop.f32.mrb[43].mxu1  ;;  %v1605_v63 = vpack.c.bf16 %v1595_v23, %v1594_v12  ;;  %p2568_p8 = pnand %p2567_p7, %p2561_p4 }
 0x2d2   :  { %v1535_v0 = vadd.f32 %v2046_v61, %v2802_v31  ;;  %v2049_v13 = vadd.f32 %v2048_v62, %v2047_v22 }
 0x2d3   :  { %2108 = vmatmul.mubr.bf16.gmra.mrb[64].mxu1 %v1605_v63 }
 0x2d4   :  { %v1583_v1 = vmul.f32 0.2, %v1535_v0  ;;  %v1538_v2 = vadd.f32 %v2049_v13, %v2802_v31  ;;  %2111 = vmatprep.mubr.msk.bf16.mxu1 %vm2602_vm11, %v2601_v3  ;;  %vm1570_vm2 = vcmp.gt.f32.partialorder %v1535_v0, 0.0 }
 0x2d6   :  { %vm1571_vm3 = vcmp.gt.f32.partialorder %v1538_v2, 0.0  ;;  %v1584_v4 = vmul.f32 0.2, %v1538_v2  ;;  %v2050_v26 = vpop.f32.mrb[44].mxu1  ;;  %v1596_v28 = vsel %vm1570_vm2, %v1535_v0, %v1583_v1 }
 0x2d7   :  { %v2051_v27 = vpop.f32.mrb[45].mxu1 }
 0x2d8   :  { %v2052_v5 = vadd.f32 %v2051_v27, %v2050_v26  ;;  %v2053_v14 = vpop.f32.mrb[46].mxu1  ;;  %v1597_v15 = vsel %vm1571_vm3, %v1538_v2, %v1584_v4 }
 0x2d9   :  { %v2054_v24 = vpop.f32.mrb[47].mxu1  ;;  %v1606_v33 = vpack.c.bf16 %v1597_v15, %v1596_v28 }
 0x2da   :  { %v1543_v25 = vadd.f32 %v2052_v5, %v2802_v31  ;;  %v2055_v34 = vadd.f32 %v2054_v24, %v2053_v14 }
 0x2db   :  { %2112 = vmatmul.mubr.bf16.gmra.mrb[68].mxu1 %v1606_v33 }
 0x2dc   :  { %v1585_v29 = vmul.f32 0.2, %v1543_v25  ;;  %v1546_v6 = vadd.f32 %v2055_v34, %v2802_v31  ;;  %2115 = vmatprep.mubr.msk.bf16.mxu1 %vm2602_vm11, %v2601_v3  ;;  %vm1572_vm4 = vcmp.gt.f32.partialorder %v1543_v25, 0.0 }
 0x2de   :  { %vm1573_vm5 = vcmp.gt.f32.partialorder %v1546_v6, 0.0  ;;  %v1586_v30 = vmul.f32 0.2, %v1546_v6  ;;  %v2056_v7 = vpop.f32.mrb[48].mxu1  ;;  %v1598_v37 = vsel %vm1572_vm4, %v1543_v25, %v1585_v29 }
 0x2df   :  { %v2057_v32 = vpop.f32.mrb[49].mxu1 }
 0x2e0   :  { %v2058_v35 = vadd.f32 %v2057_v32, %v2056_v7  ;;  %v2059_v36 = vpop.f32.mrb[50].mxu1  ;;  %v1599_v38 = vsel %vm1573_vm5, %v1546_v6, %v1586_v30 }
 0x2e1   :  { %v2060_v16 = vpop.f32.mrb[51].mxu1  ;;  %v1607_v39 = vpack.c.bf16 %v1599_v38, %v1598_v37 }
 0x2e2   :  { %v1551_v40 = vadd.f32 %v2058_v35, %v2802_v31  ;;  %v2061_v41 = vadd.f32 %v2060_v16, %v2059_v36 }
 0x2e3   :  { %2116 = vmatmul.mubr.bf16.gmra.mrb[72].mxu1 %v1607_v39 }
 0x2e4   :  { %v1587_v17 = vmul.f32 0.2, %v1551_v40  ;;  %v1554_v8 = vadd.f32 %v2061_v41, %v2802_v31  ;;  %2119 = vmatprep.mubr.msk.bf16.mxu1 %vm2602_vm11, %v2601_v3  ;;  %vm1574_vm6 = vcmp.gt.f32.partialorder %v1551_v40, 0.0 }
 0x2e6   :  { %vm1575_vm7 = vcmp.gt.f32.partialorder %v1554_v8, 0.0  ;;  %v1588_v42 = vmul.f32 0.2, %v1554_v8  ;;  %v2062_v43 = vpop.f32.mrb[52].mxu1  ;;  %v1600_v45 = vsel %vm1574_vm6, %v1551_v40, %v1587_v17 }
 0x2e7   :  { %v2063_v44 = vpop.f32.mrb[53].mxu1 }
 0x2e8   :  { %v2064_v9 = vadd.f32 %v2063_v44, %v2062_v43  ;;  %v2065_v18 = vpop.f32.mrb[54].mxu1  ;;  %v1601_v19 = vsel %vm1575_vm7, %v1554_v8, %v1588_v42 }
 0x2e9   :  { %v2066_v46 = vpop.f32.mrb[55].mxu1  ;;  %v1608_v47 = vpack.c.bf16 %v1601_v19, %v1600_v45 }
 0x2ea   :  { %v1559_v48 = vadd.f32 %v2064_v9, %v2802_v31 }
 0x2eb   :  { %2120 = vmatmul.mubr.bf16.gmra.mrb[76].mxu1 %v1608_v47 }
 0x2ec   :  { %v1589_v49 = vmul.f32 0.2, %v1559_v48  ;;  %2123 = vmatprep.mubr.msk.bf16.mxu1 %vm2602_vm11, %v2601_v3  ;;  %vm1576_vm8 = vcmp.gt.f32.partialorder %v1559_v48, 0.0 }
 0x2ee   :  { %v1602_v50 = vsel %vm1576_vm8, %v1559_v48, %v1589_v49 }
 0x2ef   :  { %v1609_v10 = vpack.c.bf16 %v1602_v50, %v1602_v50 }
 0x2f3   :  { %2124 = vmatmul.mubr.bf16.gmra.mrb[80].mxu1 %v1609_v10 }
 0x396   :  { %v1715_v11 = vpop.f32.mrb[56].mxu1 }
 0x397   :  { %v1716_v52 = vadd.f32 %v2832_v51, %v1715_v11  ;;  %v2101_v53 = vpop.f32.mrb[57].mxu1 }
 0x398   :  { %v1718_v54 = vpop.f32.mrb[58].mxu1 }
 0x399   :  { %v1769_v31 = vmax.f32 %v1716_v52, -60.0  ;;  %v1719_v20 = vadd.f32 %v2832_v51, %v1718_v54  ;;  %v2102_v55 = vpop.f32.mrb[59].mxu1 }
 0x39b   :  { %v1782_v56 = vsub.f32 0.0, %v1769_v31  ;;  %v1770_v3 = vmax.f32 %v1719_v20, -60.0 }
 0x39d   :  { %v1795_v57 = vmul.f32 1.442695, %v1782_v56  ;;  %v1783_v58 = vsub.f32 0.0, %v1770_v3 }
 0x39e   :  { %v1723_v21 = vpop.f32.mrb[60].mxu1 }
 0x39f   :  { %2420 = vpow2.f32 %v1795_v57  ;;  %v1797_v59 = vmul.f32 1.442695, %v1783_v58  ;;  %v1724_v60 = vadd.f32 %v2832_v51, %v1723_v21  ;;  %v2105_v61 = vpop.f32.mrb[61].mxu1 }
 0x3a0   :  { %v1726_v22 = vpop.f32.mrb[62].mxu1 }
 0x3a1   :  { %2422 = vpow2.f32 %v1797_v59  ;;  %v1771_v12 = vmax.f32 %v1724_v60, -60.0  ;;  %v1727_v23 = vadd.f32 %v2832_v51, %v1726_v22  ;;  %v2106_v62 = vpop.f32.mrb[63].mxu1 }
 0x3a3   :  { %v1784_v63 = vsub.f32 0.0, %v1771_v12  ;;  %v1772_v0 = vmax.f32 %v1727_v23, -60.0 }
 0x3a5   :  { %v1799_v13 = vmul.f32 1.442695, %v1784_v63  ;;  %v1785_v1 = vsub.f32 0.0, %v1772_v0 }
 0x3a6   :  { %v1731_v2 = vpop.f32.mrb[64].mxu1 }
 0x3a7   :  { %2424 = vpow2.f32 %v1799_v13  ;;  %v1801_v4 = vmul.f32 1.442695, %v1785_v1  ;;  %v1732_v26 = vadd.f32 %v2832_v51, %v1731_v2  ;;  %v2109_v27 = vpop.f32.mrb[65].mxu1 }
 0x3a8   :  { %v1734_v5 = vpop.f32.mrb[66].mxu1 }
 0x3a9   :  { %v2421_v14 = vpop.eup %2420  ;;  %2426 = vpow2.f32 %v1801_v4  ;;  %v1773_v28 = vmax.f32 %v1732_v26, -60.0  ;;  %v1735_v15 = vadd.f32 %v2832_v51, %v1734_v5  ;;  %v2110_v24 = vpop.f32.mrb[67].mxu1 }
 0x3aa   :  { %v1821_v33 = vadd.f32 1.0, %v2421_v14 }
 0x3ab   :  { %v2423_v25 = vpop.eup %2422  ;;  %v1786_v34 = vsub.f32 0.0, %v1773_v28  ;;  %v1774_v29 = vmax.f32 %v1735_v15, -60.0 }
 0x3ac   :  { %2428 = vrcp.f32 %v1821_v33  ;;  %v1822_v6 = vadd.f32 1.0, %v2423_v25 }
 0x3ad   :  { %v1803_v30 = vmul.f32 1.442695, %v1786_v34  ;;  %v1787_v7 = vsub.f32 0.0, %v1774_v29 }
 0x3ae   :  { %2430 = vrcp.f32 %v1822_v6  ;;  %v1739_v32 = vpop.f32.mrb[68].mxu1 }
 0x3af   :  { %2432 = vpow2.f32 %v1803_v30  ;;  %v1805_v35 = vmul.f32 1.442695, %v1787_v7  ;;  %v1740_v36 = vadd.f32 %v2832_v51, %v1739_v32  ;;  %v2113_v37 = vpop.f32.mrb[69].mxu1 }
 0x3b0   :  { %v1742_v38 = vpop.f32.mrb[70].mxu1 }
 0x3b1   :  { %v2425_v16 = vpop.eup %2424  ;;  %2434 = vpow2.f32 %v1805_v35  ;;  %v1775_v39 = vmax.f32 %v1740_v36, -60.0  ;;  %v1743_v40 = vadd.f32 %v2832_v51, %v1742_v38  ;;  %v2114_v41 = vpop.f32.mrb[71].mxu1 }
 0x3b2   :  { %v1823_v17 = vadd.f32 1.0, %v2425_v16 }
 0x3b3   :  { %v2427_v8 = vpop.eup %2426  ;;  %v1788_v42 = vsub.f32 0.0, %v1775_v39  ;;  %v1776_v43 = vmax.f32 %v1743_v40, -60.0 }
 0x3b4   :  { %2436 = vrcp.f32 %v1823_v17  ;;  %v1824_v44 = vadd.f32 1.0, %v2427_v8 }
 0x3b5   :  { %v1807_v9 = vmul.f32 1.442695, %v1788_v42  ;;  %v1789_v18 = vsub.f32 0.0, %v1776_v43 }
 0x3b6   :  { %v2429_v45 = vpop.eup %2428  ;;  %2438 = vrcp.f32 %v1824_v44  ;;  %v1747_v19 = vpop.f32.mrb[72].mxu1 }
 0x3b7   :  { %1847 = vst [vmem:[#allocation10] sm:$0xff] %v2429_v45  ;;  %2440 = vpow2.f32 %v1807_v9  ;;  %v1809_v46 = vmul.f32 1.442695, %v1789_v18  ;;  %v1748_v47 = vadd.f32 %v2832_v51, %v1747_v19  ;;  %v2117_v48 = vpop.f32.mrb[73].mxu1 }
 0x3b8   :  { %v2431_v49 = vpop.eup %2430  ;;  %v1750_v50 = vpop.f32.mrb[74].mxu1 }
 0x3b9   :  { %v2433_v10 = vpop.eup %2432  ;;  %1848 = vst [vmem:[#allocation10 + $0x8] sm:$0xff] %v2431_v49  ;;  %2442 = vpow2.f32 %v1809_v46  ;;  %v1777_v11 = vmax.f32 %v1748_v47, -60.0  ;;  %v1751_v52 = vadd.f32 %v2832_v51, %v1750_v50  ;;  %v2118_v53 = vpop.f32.mrb[75].mxu1 }
 0x3ba   :  { %v1825_v54 = vadd.f32 1.0, %v2433_v10 }
 0x3bb   :  { %v2435_v31 = vpop.eup %2434  ;;  %v1790_v20 = vsub.f32 0.0, %v1777_v11  ;;  %v1778_v55 = vmax.f32 %v1751_v52, -60.0 }
 0x3bc   :  { %2444 = vrcp.f32 %v1825_v54  ;;  %v1826_v56 = vadd.f32 1.0, %v2435_v31 }
 0x3bd   :  { %v1811_v3 = vmul.f32 1.442695, %v1790_v20  ;;  %v1791_v57 = vsub.f32 0.0, %v1778_v55 }
 0x3be   :  { %v2437_v58 = vpop.eup %2436  ;;  %2446 = vrcp.f32 %v1826_v56  ;;  %v1755_v21 = vpop.f32.mrb[76].mxu1 }
 0x3bf   :  { %1849 = vst [vmem:[#allocation10 + $0x10] sm:$0xff] %v2437_v58  ;;  %2448 = vpow2.f32 %v1811_v3  ;;  %v1813_v59 = vmul.f32 1.442695, %v1791_v57  ;;  %v1756_v60 = vadd.f32 %v2832_v51, %v1755_v21  ;;  %v2121_v61 = vpop.f32.mrb[77].mxu1 }
 0x3c0   :  { %v2439_v22 = vpop.eup %2438  ;;  %v1758_v12 = vpop.f32.mrb[78].mxu1 }
 0x3c1   :  { %v2441_v23 = vpop.eup %2440  ;;  %1850 = vst [vmem:[#allocation10 + $0x18] sm:$0xff] %v2439_v22  ;;  %2450 = vpow2.f32 %v1813_v59  ;;  %v1779_v62 = vmax.f32 %v1756_v60, -60.0  ;;  %v1759_v63 = vadd.f32 %v2832_v51, %v1758_v12  ;;  %v2122_v0 = vpop.f32.mrb[79].mxu1 }
 0x3c2   :  { %v1827_v13 = vadd.f32 1.0, %v2441_v23 }
 0x3c3   :  { %v2443_v1 = vpop.eup %2442  ;;  %v1792_v2 = vsub.f32 0.0, %v1779_v62  ;;  %v1780_v4 = vmax.f32 %v1759_v63, -60.0 }
 0x3c4   :  { %2452 = vrcp.f32 %v1827_v13  ;;  %v1828_v26 = vadd.f32 1.0, %v2443_v1 }
 0x3c5   :  { %v1815_v27 = vmul.f32 1.442695, %v1792_v2  ;;  %v1793_v5 = vsub.f32 0.0, %v1780_v4 }
 0x3c6   :  { %v2445_v14 = vpop.eup %2444  ;;  %2454 = vrcp.f32 %v1828_v26  ;;  %v1763_v28 = vpop.f32.mrb[80].mxu1 }
 0x3c7   :  { %1851 = vst [vmem:[#allocation10 + $0x20] sm:$0xff] %v2445_v14  ;;  %2456 = vpow2.f32 %v1815_v27  ;;  %v1817_v15 = vmul.f32 1.442695, %v1793_v5  ;;  %v1764_v24 = vadd.f32 %v2832_v51, %v1763_v28  ;;  %v2125_v33 = vpop.f32.mrb[81].mxu1 }
 0x3c8   :  { %v2447_v25 = vpop.eup %2446  ;;  %v1766_v34 = vpop.f32.mrb[82].mxu1 }
 0x3c9   :  { %v2449_v29 = vpop.eup %2448  ;;  %1852 = vst [vmem:[#allocation10 + $0x28] sm:$0xff] %v2447_v25  ;;  %2458 = vpow2.f32 %v1817_v15  ;;  %v1781_v6 = vmax.f32 %v1764_v24, -60.0  ;;  %v2126_v30 = vpop.f32.mrb[83].mxu1 }
 0x3ca   :  { %v1829_v7 = vadd.f32 1.0, %v2449_v29 }
 0x3cb   :  { %v2451_v32 = vpop.eup %2450  ;;  %v1794_v35 = vsub.f32 0.0, %v1781_v6 }
 0x3cc   :  { %2460 = vrcp.f32 %v1829_v7  ;;  %v1830_v36 = vadd.f32 1.0, %v2451_v32 }
 0x3cd   :  { %v1819_v37 = vmul.f32 1.442695, %v1794_v35 }
 0x3ce   :  { %v2453_v38 = vpop.eup %2452  ;;  %2462 = vrcp.f32 %v1830_v36 }
 0x3cf   :  { %1853 = vst [vmem:[#allocation10 + $0x30] sm:$0xff] %v2453_v38  ;;  %2464 = vpow2.f32 %v1819_v37 }
 0x3d0   :  { %v2455_v16 = vpop.eup %2454 }
 0x3d1   :  { %v2457_v51 = vpop.eup %2456  ;;  %1854 = vst [vmem:[#allocation10 + $0x38] sm:$0xff] %v2455_v16 }
 0x3d2   :  { %v1831_v39 = vadd.f32 1.0, %v2457_v51 }
 0x3d3   :  { %v2459_v40 = vpop.eup %2458 }
 0x3d4   :  { %2466 = vrcp.f32 %v1831_v39  ;;  %v1832_v41 = vadd.f32 1.0, %v2459_v40 }
 0x3d6   :  { %v2461_v17 = vpop.eup %2460  ;;  %2468 = vrcp.f32 %v1832_v41 }
 0x3d7   :  { %1855 = vst [vmem:[#allocation10 + $0x40] sm:$0xff] %v2461_v17 }
 0x3d8   :  { %v2463_v8 = vpop.eup %2462 }
 0x3d9   :  { %v2465_v42 = vpop.eup %2464  ;;  %1856 = vst [vmem:[#allocation10 + $0x48] sm:$0xff] %v2463_v8 }
 0x3da   :  { %v1833_v43 = vadd.f32 1.0, %v2465_v42 }
 0x3dc   :  { %2470 = vrcp.f32 %v1833_v43 }
 0x3de   :  { %v2467_v44 = vpop.eup %2466 }
 0x3df   :  { %1857 = vst [vmem:[#allocation10 + $0x50] sm:$0xff] %v2467_v44 }
 0x3e0   :  { %v2469_v9 = vpop.eup %2468 }
 0x3e1   :  { %1858 = vst [vmem:[#allocation10 + $0x58] sm:$0xff] %v2469_v9 }
 0x3e6   :  { %v2471_v18 = vpop.eup %2470 }
 0x3e7   :  { %1859 = vst [vmem:[#allocation10 + $0x60] sm:$0xff] %v2471_v18 }
 0x3e8   :  { %2571 = shalt.err (!%p2568_p8)
}
 0x3e9   :  { %s2572_s17 = scalar_lea.hbm %s2869_s7, 1664 }
 0x3ea   :  { %p2573_p9 = scmp.ne.s32.totalorder %s2869_s7, %s2572_s17  ;;  %p2576_p10 = scmp.lt.u32.totalorder %s2572_s17, %s2869_s7 }
 0x3ec   :  { %p2578_p11 = pnand %p2576_p10, %p2573_p9 }
 0x3ee   :  { %2581 = shalt.err (!%p2578_p11)
}
 0x3ef   :  { %1871 = dma.vmem_to_hbm [thread:$0]  %s1866_s10, 1664, %s2869_s7, [#allocation4], %s2591_s11, %s2591_s11, %s2592_s12  }
 0x3f0   :  { %2588 = dma.done.wait [#allocation4], 1664  }
 0x3f1   :  { %2589 = vsyncadd [#allocation4], 4294965632 }
 0x3f2   :  { %1875 = vsyncpa [#allocation3], 1 }
 0x3f3   :  { %1876 = vsyncpa [#allocation6], 1 }
 0x3f4   :  { %1877 = vsyncpa [#allocation9], 1 }
 0x3f5   :  { %1878 = vsyncpa [#allocation4], 1 }

</bundles_post_ra>
